<compile_context>
chip_gen: v7x
topology: tpu7x:2x2x1
jax: 0.10.0
libtpu: 0.0.40
codegen_flags: <defaults>
</compile_context>

<pallas_src>
import functools

import jax
import jax.numpy as jnp
from jax.experimental import pallas as pl
from jax.experimental.pallas import tpu as pltpu


def _round_up(x, m):
    return (x + m - 1) // m * m


# ----------------------------------------------------------------------------
# Kernel 1: LSTM recurrence (single invocation, statically unrolled time loop).
# ----------------------------------------------------------------------------
def _lstm_recurrence_kernel(gx_ref, whh_ref, h_all_ref):
    """gx_ref   : (T, B, 4H) f32        precomputed x @ W_ih + (b_ih + b_hh)
       whh_ref  : (H, 4H)    f32/bf16   hidden->gates weight (transposed)
       h_all_ref: (B, T, H)  cdt        hidden state for every step, batch-major
    """
    T, B, _ = gx_ref.shape
    H = whh_ref.shape[0]
    cdt = whh_ref.dtype

    h = jnp.zeros((B, H), jnp.float32)
    c = jnp.zeros((B, H), jnp.float32)

    # Static Python unroll: T is small and static, all indices are compile-time
    # constants, and W_hh is read from VMEM inside each matmul instead of being
    # hoisted into vregs (a (128,512) f32 hoist would be the entire vreg file,
    # forcing spills onto the serial critical path).
    for t in range(T):
        gates = gx_ref[t] + jnp.dot(h.astype(cdt), whh_ref[...],
                                    preferred_element_type=jnp.float32)
        # PyTorch LSTM gate order: input, forget, cell(g), output.
        # H % 128 == 0 keeps these slices lane-aligned (no XLU relayout).
        i_g = jax.nn.sigmoid(gates[:, 0 * H:1 * H])
        f_g = jax.nn.sigmoid(gates[:, 1 * H:2 * H])
        g_g = jnp.tanh(gates[:, 2 * H:3 * H])
        o_g = jax.nn.sigmoid(gates[:, 3 * H:4 * H])
        c = f_g * c + i_g * g_g
        h = o_g * jnp.tanh(c)
        # Batch-major, static-index write: the vocab head consumes h_all with a
        # free reshape (no XLA transpose / dtype convert between pallas_calls).
        h_all_ref[:, t, :] = h.astype(h_all_ref.dtype)


def _run_lstm_recurrence(gates_x, w_hh_t, out_dtype):
    T, B, _ = gates_x.shape
    H = w_hh_t.shape[0]
    # Whole arrays resident in VMEM (tiny at these shapes).
    # TODO(synk): for very long T / large B (esp. v7x's 64 MiB VMEM), chunk T
    # with a grid axis marked "arbitrary", carry h/c in VMEM scratch, and keep
    # gates_x resident in bf16 (upcast per step).
    need = (gates_x.size * gates_x.dtype.itemsize
            + w_hh_t.size * w_hh_t.dtype.itemsize
            + T * B * H * jnp.dtype(out_dtype).itemsize)
    vmem_limit = int(min(max(2 * need + (2 << 20), 16 << 20), 96 << 20))
    return pl.pallas_call(
        _lstm_recurrence_kernel,
        out_shape=jax.ShapeDtypeStruct((B, T, H), out_dtype),
        in_specs=[
            pl.BlockSpec(memory_space=pltpu.MemorySpace.VMEM),
            pl.BlockSpec(memory_space=pltpu.MemorySpace.VMEM),
        ],
        out_specs=pl.BlockSpec(memory_space=pltpu.MemorySpace.VMEM),
        compiler_params=pltpu.CompilerParams(vmem_limit_bytes=vmem_limit),
    )(gates_x, w_hh_t)


# ----------------------------------------------------------------------------
# Kernel 2: batched output projection (rows x V, tiled, fully parallel).
# ----------------------------------------------------------------------------
def _linear_head_kernel(x_ref, w_ref, b_ref, o_ref):
    o_ref[...] = (jnp.dot(x_ref[...], w_ref[...],
                          preferred_element_type=jnp.float32)
                  + b_ref[...]).astype(o_ref.dtype)


def _linear_head(x, w, b, *, tile_m, tile_v):
    M, H = x.shape
    V = w.shape[1]
    # Padded, 128-lane-aligned tiles (no "single giant tile" fallback).
    tm = min(tile_m, _round_up(M, 8))
    tv = min(tile_v, _round_up(V, 128))
    Mp = _round_up(M, tm)
    Vp = _round_up(V, tv)
    if Mp != M:
        x = jnp.pad(x, ((0, Mp - M), (0, 0)))
    if Vp != V:
        w = jnp.pad(w, ((0, 0), (0, Vp - V)))
        b = jnp.pad(b, ((0, 0), (0, Vp - V)))

    tile_bytes = (tm * H * x.dtype.itemsize + H * tv * w.dtype.itemsize
                  + tv * b.dtype.itemsize + tm * tv * 4)
    vmem_limit = int(min(max(2 * tile_bytes + (2 << 20), 16 << 20), 96 << 20))

    out = pl.pallas_call(
        _linear_head_kernel,
        out_shape=jax.ShapeDtypeStruct((Mp, Vp), jnp.float32),
        # V is the OUTER grid axis: each (H, tv) slab of W_out is DMA'd from
        # HBM exactly once and reused across every row tile (the small x tiles
        # are the cheap re-fetch).  Both axes are independent -> v7x can split
        # the grid across its two TensorCores.
        grid=(Vp // tv, Mp // tm),
        in_specs=[
            pl.BlockSpec((tm, H), lambda v, m: (m, 0)),
            pl.BlockSpec((H, tv), lambda v, m: (0, v)),
            pl.BlockSpec((1, tv), lambda v, m: (0, v)),
        ],
        out_specs=pl.BlockSpec((tm, tv), lambda v, m: (m, v)),
        compiler_params=pltpu.CompilerParams(
            dimension_semantics=("parallel", "parallel"),
            vmem_limit_bytes=vmem_limit,
        ),
        cost_estimate=pl.CostEstimate(
            flops=2 * Mp * Vp * H,
            transcendentals=0,
            bytes_accessed=int(x.size * x.dtype.itemsize
                               + w.size * w.dtype.itemsize
                               + b.size * b.dtype.itemsize
                               + Mp * Vp * 4),
        ),
    )(x, w, b)
    if Mp != M or Vp != V:
        out = out[:M, :V]
    return out


# ----------------------------------------------------------------------------
# Forward pass (same semantics as DecoderRNN.forward)
# ----------------------------------------------------------------------------
def prepare_params(params, compute_dtype):
    """Cast the weight matrices ONCE outside the jitted forward, so no per-call
    HBM round-trip materializing bf16 copies of the largest tensors."""
    p = dict(params)
    for name in ("embed", "w_ih_t", "w_hh_t", "w_out_t"):
        p[name] = params[name].astype(compute_dtype)
    return p


@functools.partial(jax.jit, static_argnames=("head_tile_m", "head_tile_v"))
def decoder_rnn_forward(features, captions, params, *,
                        head_tile_m=256, head_tile_v=2048):
    """features : (B, E) f32, captions : (B, Tc) i32 -> (B, Tc, V) f32 logits.
    Compute dtype (f32 or bf16 MXU operands, always f32 accumulation) is taken
    from the pre-cast weights in `params`."""
    embed_w = params["embed"]        # (V, E)   compute dtype
    w_ih_t = params["w_ih_t"]        # (E, 4H)  compute dtype
    w_hh_t = params["w_hh_t"]        # (H, 4H)  compute dtype
    b_gates = params["b_gates"]      # (1, 4H)  f32  = b_ih + b_hh
    w_out_t = params["w_out_t"]      # (H, V)   compute dtype
    b_out = params["b_out"]          # (1, V)   f32
    cdt = w_hh_t.dtype

    B = features.shape[0]
    H = w_hh_t.shape[0]
    V = w_out_t.shape[1]

    # --- glue: embedding lookup + concat (same semantics as torch) ----------
    embedded_capt = jnp.take(embed_w, captions[:, :-1], axis=0)   # (B, Tc-1, E)
    x = jnp.concatenate([features.astype(cdt)[:, None, :], embedded_capt],
                        axis=1)                                   # (B, T, E)
    T = x.shape[1]

    # --- hoisted input projection: one batched matmul for all timesteps -----
    # Output produced directly time-major (T, B, 4H); f32 accumulation.
    gates_x = jnp.einsum("bte,eg->tbg", x, w_ih_t,
                         preferred_element_type=jnp.float32,
                         precision="highest") + b_gates

    # --- serial LSTM recurrence: only h @ W_hh per step ----------------------
    h_all = _run_lstm_recurrence(gates_x, w_hh_t, out_dtype=cdt)  # (B, T, H)

    # --- batched vocabulary head over all B*T rows ---------------------------
    h_rows = h_all.reshape(B * T, H)        # free: batch-major, compute dtype
    logits = _linear_head(h_rows, w_out_t, b_out,
                          tile_m=head_tile_m, tile_v=head_tile_v)  # (B*T, V)
    return logits.reshape(B, T, V)


# ----------------------------------------------------------------------------
# Pure-JAX reference (mirrors torch nn.LSTM + nn.Linear).  bf16 operands are
# upcast to f32 before every dot — numerically identical to bf16 MXU matmuls
# with f32 accumulation, and safe on every backend (no BF16xBF16->F32 dot).
# ----------------------------------------------------------------------------
def _reference_forward(features, captions, params):
    f32 = jnp.float32
    cdt = params["w_hh_t"].dtype
    embed_w = params["embed"]
    H = params["w_hh_t"].shape[0]
    w_ih = params["w_ih_t"].astype(f32)
    w_hh = params["w_hh_t"].astype(f32)
    w_out = params["w_out_t"].astype(f32)
    b_gates = params["b_gates"]
    b_out = params["b_out"]

    embedded_capt = jnp.take(embed_w, captions[:, :-1], axis=0)
    x = jnp.concatenate([features.astype(embed_w.dtype)[:, None, :],
                         embedded_capt], axis=1)
    B = x.shape[0]

    def step(carry, x_t):
        h, c = carry
        gates = (jnp.dot(x_t.astype(cdt).astype(f32), w_ih, precision="highest")
                 + jnp.dot(h.astype(cdt).astype(f32), w_hh, precision="highest")
                 + b_gates)
        i = jax.nn.sigmoid(gates[:, 0 * H:1 * H])
        f = jax.nn.sigmoid(gates[:, 1 * H:2 * H])
        g = jnp.tanh(gates[:, 2 * H:3 * H])
        o = jax.nn.sigmoid(gates[:, 3 * H:4 * H])
        c = f * c + i * g
        h = o * jnp.tanh(c)
        out = (jnp.dot(h.astype(cdt).astype(f32), w_out, precision="highest")
               + b_out)
        return (h, c), out

    init = (jnp.zeros((B, H), f32), jnp.zeros((B, H), f32))
    _, outs = jax.lax.scan(step, init, jnp.transpose(x, (1, 0, 2)))
    return jnp.transpose(outs, (1, 0, 2))


def init_params(key, embed_size, hidden_size, vocab_size):
    k = jax.random.split(key, 6)
    s = 0.1
    return {
        "embed":   s * jax.random.normal(k[0], (vocab_size, embed_size), jnp.float32),
        "w_ih_t":  s * jax.random.normal(k[1], (embed_size, 4 * hidden_size), jnp.float32),
        "w_hh_t":  s * jax.random.normal(k[2], (hidden_size, 4 * hidden_size), jnp.float32),
        "b_gates": s * jax.random.normal(k[3], (1, 4 * hidden_size), jnp.float32),
        "w_out_t": s * jax.random.normal(k[4], (hidden_size, vocab_size), jnp.float32),
        "b_out":   s * jax.random.normal(k[5], (1, vocab_size), jnp.float32),
    }


if __name__ == "__main__":
    # Small, deterministic shapes consistent with the module.
    # hidden_size = 128 keeps the 4 gate slices 128-lane aligned.
    batch = 8
    embed_size = 128
    hidden_size = 128
    vocab_size = 256
    caption_len = 8   # LSTM sequence length = 1 feature + (caption_len - 1) tokens

    key = jax.random.PRNGKey(0)
    k_feat, k_cap, k_par = jax.random.split(key, 3)

    features = jax.random.normal(k_feat, (batch, embed_size), jnp.float32)
    captions = jax.random.randint(k_cap, (batch, caption_len), 0, vocab_size,
                                  dtype=jnp.int32)
    params = init_params(k_par, embed_size, hidden_size, vocab_size)

    # f32 path (exact module semantics) — runs on any backend.
    p32 = prepare_params(params, jnp.float32)
    out = decoder_rnn_forward(features, captions, p32)
    out = jax.block_until_ready(out)
    ref = _reference_forward(features, captions, p32)
    assert out.shape == (batch, caption_len, vocab_size)
    assert jnp.allclose(out, ref, atol=2e-3, rtol=2e-3), "f32 mismatch vs reference"

    # bf16-MXU path (recommended production configuration: bf16 operands, f32
    # accumulation, f32 gate math).  Only exercised on an actual TPU backend:
    # XLA's CPU dot thunk does not implement BF16 x BF16 -> F32, which is what
    # broke the previous version under interpret mode.
    if jax.default_backend() == "tpu":
        pbf16 = prepare_params(params, jnp.bfloat16)
        out_bf16 = decoder_rnn_forward(features, captions, pbf16)
        out_bf16 = jax.block_until_ready(out_bf16)
        ref_bf16 = _reference_forward(features, captions, pbf16)
        assert jnp.allclose(out_bf16, ref_bf16, atol=3e-2, rtol=3e-2), \
            "bf16 mismatch vs reference"

    # TODO(synk): the autoregressive `sample()` loop (data-dependent stopping on
    # word_id == 1) has no clean static-grid Pallas equivalent and is omitted.
    print("KERNEL_OK")
</pallas_src>

<mosaic_0001>
module attributes {stable_mosaic.version = 11 : i64} {
  func.func @_lstm_recurrence_kernel(%arg0: memref<8x8x512xf32, #tpu.memory_space<vmem>>, %arg1: memref<128x512xf32, #tpu.memory_space<vmem>>, %arg2: memref<8x8x128xf32, #tpu.memory_space<vmem>>) attributes {dimension_semantics = [], scalar_prefetch = 0 : i64, scratch_operands = 0 : i64, tpu.core_type = #tpu.core_type<tc>} {
    %cst = arith.constant 0.000000e+00 : f32
    %0 = vector.broadcast %cst : f32 to vector<8x128xf32>
    %cst_0 = arith.constant 0.000000e+00 : f32
    %1 = vector.broadcast %cst_0 : f32 to vector<8x128xf32>
    %c0 = arith.constant 0 : index
    %c0_1 = arith.constant 0 : index
    %c0_2 = arith.constant 0 : index
    %2 = vector.load %arg0[%c0, %c0_1, %c0_2] : memref<8x8x512xf32, #tpu.memory_space<vmem>>, vector<1x8x512xf32>
    %3 = vector.shape_cast %2 : vector<1x8x512xf32> to vector<8x512xf32>
    %c0_3 = arith.constant 0 : index
    %c0_4 = arith.constant 0 : index
    %4 = vector.load %arg1[%c0_3, %c0_4] : memref<128x512xf32, #tpu.memory_space<vmem>>, vector<128x512xf32>
    %cst_5 = arith.constant dense<0.000000e+00> : vector<8x512xf32>
    %5 = tpu.matmul %0, %4, %cst_5 {dimension_numbers = #tpu.dot_dimension_numbers<[1], [0], [0], [1], [0, 0, 1, 1], [], []>} : vector<8x128xf32>, vector<128x512xf32>, vector<8x512xf32> -> vector<8x512xf32>
    %6 = arith.addf %3, %5 : vector<8x512xf32>
    %7 = vector.extract_strided_slice %6 {offsets = [0, 0], sizes = [8, 128], strides = [1, 1]} : vector<8x512xf32> to vector<8x128xf32>
    %8 = arith.negf %7 : vector<8x128xf32>
    %9 = math.exp %8 : vector<8x128xf32>
    %cst_6 = arith.constant 1.000000e+00 : f32
    %10 = vector.broadcast %cst_6 : f32 to vector<8x128xf32>
    %11 = arith.addf %10, %9 : vector<8x128xf32>
    %12 = arith.divf %10, %11 : vector<8x128xf32>
    %13 = vector.extract_strided_slice %6 {offsets = [0, 128], sizes = [8, 128], strides = [1, 1]} : vector<8x512xf32> to vector<8x128xf32>
    %14 = arith.negf %13 : vector<8x128xf32>
    %15 = math.exp %14 : vector<8x128xf32>
    %cst_7 = arith.constant 1.000000e+00 : f32
    %16 = vector.broadcast %cst_7 : f32 to vector<8x128xf32>
    %17 = arith.addf %16, %15 : vector<8x128xf32>
    %18 = arith.divf %16, %17 : vector<8x128xf32>
    %19 = vector.extract_strided_slice %6 {offsets = [0, 256], sizes = [8, 128], strides = [1, 1]} : vector<8x512xf32> to vector<8x128xf32>
    %20 = math.tanh %19 : vector<8x128xf32>
    %21 = vector.extract_strided_slice %6 {offsets = [0, 384], sizes = [8, 128], strides = [1, 1]} : vector<8x512xf32> to vector<8x128xf32>
    %22 = arith.negf %21 : vector<8x128xf32>
    %23 = math.exp %22 : vector<8x128xf32>
    %cst_8 = arith.constant 1.000000e+00 : f32
    %24 = vector.broadcast %cst_8 : f32 to vector<8x128xf32>
    %25 = arith.addf %24, %23 : vector<8x128xf32>
    %26 = arith.divf %24, %25 : vector<8x128xf32>
    %27 = arith.mulf %18, %1 : vector<8x128xf32>
    %28 = arith.mulf %12, %20 : vector<8x128xf32>
    %29 = arith.addf %27, %28 : vector<8x128xf32>
    %30 = math.tanh %29 : vector<8x128xf32>
    %31 = arith.mulf %26, %30 : vector<8x128xf32>
    %c0_9 = arith.constant 0 : index
    %c0_10 = arith.constant 0 : index
    %c0_11 = arith.constant 0 : index
    %32 = vector.load %arg2[%c0_9, %c0_10, %c0_11] : memref<8x8x128xf32, #tpu.memory_space<vmem>>, vector<8x1x128xf32>
    %33 = vector.shape_cast %32 : vector<8x1x128xf32> to vector<8x128xf32>
    %34 = vector.shape_cast %31 : vector<8x128xf32> to vector<8x1x128xf32>
    tpu.vector_store %arg2[%c0_9, %c0_10, %c0_11], %34 {strides = array<i32>} : memref<8x8x128xf32, #tpu.memory_space<vmem>>, vector<8x1x128xf32>,
    %c1 = arith.constant 1 : index
    %c0_12 = arith.constant 0 : index
    %c0_13 = arith.constant 0 : index
    %35 = vector.load %arg0[%c1, %c0_12, %c0_13] : memref<8x8x512xf32, #tpu.memory_space<vmem>>, vector<1x8x512xf32>
    %36 = vector.shape_cast %35 : vector<1x8x512xf32> to vector<8x512xf32>
    %c0_14 = arith.constant 0 : index
    %c0_15 = arith.constant 0 : index
    %37 = vector.load %arg1[%c0_14, %c0_15] : memref<128x512xf32, #tpu.memory_space<vmem>>, vector<128x512xf32>
    %cst_16 = arith.constant dense<0.000000e+00> : vector<8x512xf32>
    %38 = tpu.matmul %31, %37, %cst_16 {dimension_numbers = #tpu.dot_dimension_numbers<[1], [0], [0], [1], [0, 0, 1, 1], [], []>} : vector<8x128xf32>, vector<128x512xf32>, vector<8x512xf32> -> vector<8x512xf32>
    %39 = arith.addf %36, %38 : vector<8x512xf32>
    %40 = vector.extract_strided_slice %39 {offsets = [0, 0], sizes = [8, 128], strides = [1, 1]} : vector<8x512xf32> to vector<8x128xf32>
    %41 = arith.negf %40 : vector<8x128xf32>
    %42 = math.exp %41 : vector<8x128xf32>
    %cst_17 = arith.constant 1.000000e+00 : f32
    %43 = vector.broadcast %cst_17 : f32 to vector<8x128xf32>
    %44 = arith.addf %43, %42 : vector<8x128xf32>
    %45 = arith.divf %43, %44 : vector<8x128xf32>
    %46 = vector.extract_strided_slice %39 {offsets = [0, 128], sizes = [8, 128], strides = [1, 1]} : vector<8x512xf32> to vector<8x128xf32>
    %47 = arith.negf %46 : vector<8x128xf32>
    %48 = math.exp %47 : vector<8x128xf32>
    %cst_18 = arith.constant 1.000000e+00 : f32
    %49 = vector.broadcast %cst_18 : f32 to vector<8x128xf32>
    %50 = arith.addf %49, %48 : vector<8x128xf32>
    %51 = arith.divf %49, %50 : vector<8x128xf32>
    %52 = vector.extract_strided_slice %39 {offsets = [0, 256], sizes = [8, 128], strides = [1, 1]} : vector<8x512xf32> to vector<8x128xf32>
    %53 = math.tanh %52 : vector<8x128xf32>
    %54 = vector.extract_strided_slice %39 {offsets = [0, 384], sizes = [8, 128], strides = [1, 1]} : vector<8x512xf32> to vector<8x128xf32>
    %55 = arith.negf %54 : vector<8x128xf32>
    %56 = math.exp %55 : vector<8x128xf32>
    %cst_19 = arith.constant 1.000000e+00 : f32
    %57 = vector.broadcast %cst_19 : f32 to vector<8x128xf32>
    %58 = arith.addf %57, %56 : vector<8x128xf32>
    %59 = arith.divf %57, %58 : vector<8x128xf32>
    %60 = arith.mulf %51, %29 : vector<8x128xf32>
    %61 = arith.mulf %45, %53 : vector<8x128xf32>
    %62 = arith.addf %60, %61 : vector<8x128xf32>
    %63 = math.tanh %62 : vector<8x128xf32>
    %64 = arith.mulf %59, %63 : vector<8x128xf32>
    %c0_20 = arith.constant 0 : index
    %c1_21 = arith.constant 1 : index
    %c0_22 = arith.constant 0 : index
    %65 = vector.load %arg2[%c0_20, %c1_21, %c0_22] : memref<8x8x128xf32, #tpu.memory_space<vmem>>, vector<8x1x128xf32>
    %66 = vector.shape_cast %65 : vector<8x1x128xf32> to vector<8x128xf32>
    %67 = vector.shape_cast %64 : vector<8x128xf32> to vector<8x1x128xf32>
    tpu.vector_store %arg2[%c0_20, %c1_21, %c0_22], %67 {strides = array<i32>} : memref<8x8x128xf32, #tpu.memory_space<vmem>>, vector<8x1x128xf32>,
    %c2 = arith.constant 2 : index
    %c0_23 = arith.constant 0 : index
    %c0_24 = arith.constant 0 : index
    %68 = vector.load %arg0[%c2, %c0_23, %c0_24] : memref<8x8x512xf32, #tpu.memory_space<vmem>>, vector<1x8x512xf32>
    %69 = vector.shape_cast %68 : vector<1x8x512xf32> to vector<8x512xf32>
    %c0_25 = arith.constant 0 : index
    %c0_26 = arith.constant 0 : index
    %70 = vector.load %arg1[%c0_25, %c0_26] : memref<128x512xf32, #tpu.memory_space<vmem>>, vector<128x512xf32>
    %cst_27 = arith.constant dense<0.000000e+00> : vector<8x512xf32>
    %71 = tpu.matmul %64, %70, %cst_27 {dimension_numbers = #tpu.dot_dimension_numbers<[1], [0], [0], [1], [0, 0, 1, 1], [], []>} : vector<8x128xf32>, vector<128x512xf32>, vector<8x512xf32> -> vector<8x512xf32>
    %72 = arith.addf %69, %71 : vector<8x512xf32>
    %73 = vector.extract_strided_slice %72 {offsets = [0, 0], sizes = [8, 128], strides = [1, 1]} : vector<8x512xf32> to vector<8x128xf32>
    %74 = arith.negf %73 : vector<8x128xf32>
    %75 = math.exp %74 : vector<8x128xf32>
    %cst_28 = arith.constant 1.000000e+00 : f32
    %76 = vector.broadcast %cst_28 : f32 to vector<8x128xf32>
    %77 = arith.addf %76, %75 : vector<8x128xf32>
    %78 = arith.divf %76, %77 : vector<8x128xf32>
    %79 = vector.extract_strided_slice %72 {offsets = [0, 128], sizes = [8, 128], strides = [1, 1]} : vector<8x512xf32> to vector<8x128xf32>
    %80 = arith.negf %79 : vector<8x128xf32>
    %81 = math.exp %80 : vector<8x128xf32>
    %cst_29 = arith.constant 1.000000e+00 : f32
    %82 = vector.broadcast %cst_29 : f32 to vector<8x128xf32>
    %83 = arith.addf %82, %81 : vector<8x128xf32>
    %84 = arith.divf %82, %83 : vector<8x128xf32>
    %85 = vector.extract_strided_slice %72 {offsets = [0, 256], sizes = [8, 128], strides = [1, 1]} : vector<8x512xf32> to vector<8x128xf32>
    %86 = math.tanh %85 : vector<8x128xf32>
    %87 = vector.extract_strided_slice %72 {offsets = [0, 384], sizes = [8, 128], strides = [1, 1]} : vector<8x512xf32> to vector<8x128xf32>
    %88 = arith.negf %87 : vector<8x128xf32>
    %89 = math.exp %88 : vector<8x128xf32>
    %cst_30 = arith.constant 1.000000e+00 : f32
    %90 = vector.broadcast %cst_30 : f32 to vector<8x128xf32>
    %91 = arith.addf %90, %89 : vector<8x128xf32>
    %92 = arith.divf %90, %91 : vector<8x128xf32>
    %93 = arith.mulf %84, %62 : vector<8x128xf32>
    %94 = arith.mulf %78, %86 : vector<8x128xf32>
    %95 = arith.addf %93, %94 : vector<8x128xf32>
    %96 = math.tanh %95 : vector<8x128xf32>
    %97 = arith.mulf %92, %96 : vector<8x128xf32>
    %c0_31 = arith.constant 0 : index
    %c2_32 = arith.constant 2 : index
    %c0_33 = arith.constant 0 : index
    %98 = vector.load %arg2[%c0_31, %c2_32, %c0_33] : memref<8x8x128xf32, #tpu.memory_space<vmem>>, vector<8x1x128xf32>
    %99 = vector.shape_cast %98 : vector<8x1x128xf32> to vector<8x128xf32>
    %100 = vector.shape_cast %97 : vector<8x128xf32> to vector<8x1x128xf32>
    tpu.vector_store %arg2[%c0_31, %c2_32, %c0_33], %100 {strides = array<i32>} : memref<8x8x128xf32, #tpu.memory_space<vmem>>, vector<8x1x128xf32>,
    %c3 = arith.constant 3 : index
    %c0_34 = arith.constant 0 : index
    %c0_35 = arith.constant 0 : index
    %101 = vector.load %arg0[%c3, %c0_34, %c0_35] : memref<8x8x512xf32, #tpu.memory_space<vmem>>, vector<1x8x512xf32>
    %102 = vector.shape_cast %101 : vector<1x8x512xf32> to vector<8x512xf32>
    %c0_36 = arith.constant 0 : index
    %c0_37 = arith.constant 0 : index
    %103 = vector.load %arg1[%c0_36, %c0_37] : memref<128x512xf32, #tpu.memory_space<vmem>>, vector<128x512xf32>
    %cst_38 = arith.constant dense<0.000000e+00> : vector<8x512xf32>
    %104 = tpu.matmul %97, %103, %cst_38 {dimension_numbers = #tpu.dot_dimension_numbers<[1], [0], [0], [1], [0, 0, 1, 1], [], []>} : vector<8x128xf32>, vector<128x512xf32>, vector<8x512xf32> -> vector<8x512xf32>
    %105 = arith.addf %102, %104 : vector<8x512xf32>
    %106 = vector.extract_strided_slice %105 {offsets = [0, 0], sizes = [8, 128], strides = [1, 1]} : vector<8x512xf32> to vector<8x128xf32>
    %107 = arith.negf %106 : vector<8x128xf32>
    %108 = math.exp %107 : vector<8x128xf32>
    %cst_39 = arith.constant 1.000000e+00 : f32
    %109 = vector.broadcast %cst_39 : f32 to vector<8x128xf32>
    %110 = arith.addf %109, %108 : vector<8x128xf32>
    %111 = arith.divf %109, %110 : vector<8x128xf32>
    %112 = vector.extract_strided_slice %105 {offsets = [0, 128], sizes = [8, 128], strides = [1, 1]} : vector<8x512xf32> to vector<8x128xf32>
    %113 = arith.negf %112 : vector<8x128xf32>
    %114 = math.exp %113 : vector<8x128xf32>
    %cst_40 = arith.constant 1.000000e+00 : f32
    %115 = vector.broadcast %cst_40 : f32 to vector<8x128xf32>
    %116 = arith.addf %115, %114 : vector<8x128xf32>
    %117 = arith.divf %115, %116 : vector<8x128xf32>
    %118 = vector.extract_strided_slice %105 {offsets = [0, 256], sizes = [8, 128], strides = [1, 1]} : vector<8x512xf32> to vector<8x128xf32>
    %119 = math.tanh %118 : vector<8x128xf32>
    %120 = vector.extract_strided_slice %105 {offsets = [0, 384], sizes = [8, 128], strides = [1, 1]} : vector<8x512xf32> to vector<8x128xf32>
    %121 = arith.negf %120 : vector<8x128xf32>
    %122 = math.exp %121 : vector<8x128xf32>
    %cst_41 = arith.constant 1.000000e+00 : f32
    %123 = vector.broadcast %cst_41 : f32 to vector<8x128xf32>
    %124 = arith.addf %123, %122 : vector<8x128xf32>
    %125 = arith.divf %123, %124 : vector<8x128xf32>
    %126 = arith.mulf %117, %95 : vector<8x128xf32>
    %127 = arith.mulf %111, %119 : vector<8x128xf32>
    %128 = arith.addf %126, %127 : vector<8x128xf32>
    %129 = math.tanh %128 : vector<8x128xf32>
    %130 = arith.mulf %125, %129 : vector<8x128xf32>
    %c0_42 = arith.constant 0 : index
    %c3_43 = arith.constant 3 : index
    %c0_44 = arith.constant 0 : index
    %131 = vector.load %arg2[%c0_42, %c3_43, %c0_44] : memref<8x8x128xf32, #tpu.memory_space<vmem>>, vector<8x1x128xf32>
    %132 = vector.shape_cast %131 : vector<8x1x128xf32> to vector<8x128xf32>
    %133 = vector.shape_cast %130 : vector<8x128xf32> to vector<8x1x128xf32>
    tpu.vector_store %arg2[%c0_42, %c3_43, %c0_44], %133 {strides = array<i32>} : memref<8x8x128xf32, #tpu.memory_space<vmem>>, vector<8x1x128xf32>,
    %c4 = arith.constant 4 : index
    %c0_45 = arith.constant 0 : index
    %c0_46 = arith.constant 0 : index
    %134 = vector.load %arg0[%c4, %c0_45, %c0_46] : memref<8x8x512xf32, #tpu.memory_space<vmem>>, vector<1x8x512xf32>
    %135 = vector.shape_cast %134 : vector<1x8x512xf32> to vector<8x512xf32>
    %c0_47 = arith.constant 0 : index
    %c0_48 = arith.constant 0 : index
    %136 = vector.load %arg1[%c0_47, %c0_48] : memref<128x512xf32, #tpu.memory_space<vmem>>, vector<128x512xf32>
    %cst_49 = arith.constant dense<0.000000e+00> : vector<8x512xf32>
    %137 = tpu.matmul %130, %136, %cst_49 {dimension_numbers = #tpu.dot_dimension_numbers<[1], [0], [0], [1], [0, 0, 1, 1], [], []>} : vector<8x128xf32>, vector<128x512xf32>, vector<8x512xf32> -> vector<8x512xf32>
    %138 = arith.addf %135, %137 : vector<8x512xf32>
    %139 = vector.extract_strided_slice %138 {offsets = [0, 0], sizes = [8, 128], strides = [1, 1]} : vector<8x512xf32> to vector<8x128xf32>
    %140 = arith.negf %139 : vector<8x128xf32>
    %141 = math.exp %140 : vector<8x128xf32>
    %cst_50 = arith.constant 1.000000e+00 : f32
    %142 = vector.broadcast %cst_50 : f32 to vector<8x128xf32>
    %143 = arith.addf %142, %141 : vector<8x128xf32>
    %144 = arith.divf %142, %143 : vector<8x128xf32>
    %145 = vector.extract_strided_slice %138 {offsets = [0, 128], sizes = [8, 128], strides = [1, 1]} : vector<8x512xf32> to vector<8x128xf32>
    %146 = arith.negf %145 : vector<8x128xf32>
    %147 = math.exp %146 : vector<8x128xf32>
    %cst_51 = arith.constant 1.000000e+00 : f32
    %148 = vector.broadcast %cst_51 : f32 to vector<8x128xf32>
    %149 = arith.addf %148, %147 : vector<8x128xf32>
    %150 = arith.divf %148, %149 : vector<8x128xf32>
    %151 = vector.extract_strided_slice %138 {offsets = [0, 256], sizes = [8, 128], strides = [1, 1]} : vector<8x512xf32> to vector<8x128xf32>
    %152 = math.tanh %151 : vector<8x128xf32>
    %153 = vector.extract_strided_slice %138 {offsets = [0, 384], sizes = [8, 128], strides = [1, 1]} : vector<8x512xf32> to vector<8x128xf32>
    %154 = arith.negf %153 : vector<8x128xf32>
    %155 = math.exp %154 : vector<8x128xf32>
    %cst_52 = arith.constant 1.000000e+00 : f32
    %156 = vector.broadcast %cst_52 : f32 to vector<8x128xf32>
    %157 = arith.addf %156, %155 : vector<8x128xf32>
    %158 = arith.divf %156, %157 : vector<8x128xf32>
    %159 = arith.mulf %150, %128 : vector<8x128xf32>
    %160 = arith.mulf %144, %152 : vector<8x128xf32>
    %161 = arith.addf %159, %160 : vector<8x128xf32>
    %162 = math.tanh %161 : vector<8x128xf32>
    %163 = arith.mulf %158, %162 : vector<8x128xf32>
    %c0_53 = arith.constant 0 : index
    %c4_54 = arith.constant 4 : index
    %c0_55 = arith.constant 0 : index
    %164 = vector.load %arg2[%c0_53, %c4_54, %c0_55] : memref<8x8x128xf32, #tpu.memory_space<vmem>>, vector<8x1x128xf32>
    %165 = vector.shape_cast %164 : vector<8x1x128xf32> to vector<8x128xf32>
    %166 = vector.shape_cast %163 : vector<8x128xf32> to vector<8x1x128xf32>
    tpu.vector_store %arg2[%c0_53, %c4_54, %c0_55], %166 {strides = array<i32>} : memref<8x8x128xf32, #tpu.memory_space<vmem>>, vector<8x1x128xf32>,
    %c5 = arith.constant 5 : index
    %c0_56 = arith.constant 0 : index
    %c0_57 = arith.constant 0 : index
    %167 = vector.load %arg0[%c5, %c0_56, %c0_57] : memref<8x8x512xf32, #tpu.memory_space<vmem>>, vector<1x8x512xf32>
    %168 = vector.shape_cast %167 : vector<1x8x512xf32> to vector<8x512xf32>
    %c0_58 = arith.constant 0 : index
    %c0_59 = arith.constant 0 : index
    %169 = vector.load %arg1[%c0_58, %c0_59] : memref<128x512xf32, #tpu.memory_space<vmem>>, vector<128x512xf32>
    %cst_60 = arith.constant dense<0.000000e+00> : vector<8x512xf32>
    %170 = tpu.matmul %163, %169, %cst_60 {dimension_numbers = #tpu.dot_dimension_numbers<[1], [0], [0], [1], [0, 0, 1, 1], [], []>} : vector<8x128xf32>, vector<128x512xf32>, vector<8x512xf32> -> vector<8x512xf32>
    %171 = arith.addf %168, %170 : vector<8x512xf32>
    %172 = vector.extract_strided_slice %171 {offsets = [0, 0], sizes = [8, 128], strides = [1, 1]} : vector<8x512xf32> to vector<8x128xf32>
    %173 = arith.negf %172 : vector<8x128xf32>
    %174 = math.exp %173 : vector<8x128xf32>
    %cst_61 = arith.constant 1.000000e+00 : f32
    %175 = vector.broadcast %cst_61 : f32 to vector<8x128xf32>
    %176 = arith.addf %175, %174 : vector<8x128xf32>
    %177 = arith.divf %175, %176 : vector<8x128xf32>
    %178 = vector.extract_strided_slice %171 {offsets = [0, 128], sizes = [8, 128], strides = [1, 1]} : vector<8x512xf32> to vector<8x128xf32>
    %179 = arith.negf %178 : vector<8x128xf32>
    %180 = math.exp %179 : vector<8x128xf32>
    %cst_62 = arith.constant 1.000000e+00 : f32
    %181 = vector.broadcast %cst_62 : f32 to vector<8x128xf32>
    %182 = arith.addf %181, %180 : vector<8x128xf32>
    %183 = arith.divf %181, %182 : vector<8x128xf32>
    %184 = vector.extract_strided_slice %171 {offsets = [0, 256], sizes = [8, 128], strides = [1, 1]} : vector<8x512xf32> to vector<8x128xf32>
    %185 = math.tanh %184 : vector<8x128xf32>
    %186 = vector.extract_strided_slice %171 {offsets = [0, 384], sizes = [8, 128], strides = [1, 1]} : vector<8x512xf32> to vector<8x128xf32>
    %187 = arith.negf %186 : vector<8x128xf32>
    %188 = math.exp %187 : vector<8x128xf32>
    %cst_63 = arith.constant 1.000000e+00 : f32
    %189 = vector.broadcast %cst_63 : f32 to vector<8x128xf32>
    %190 = arith.addf %189, %188 : vector<8x128xf32>
    %191 = arith.divf %189, %190 : vector<8x128xf32>
    %192 = arith.mulf %183, %161 : vector<8x128xf32>
    %193 = arith.mulf %177, %185 : vector<8x128xf32>
    %194 = arith.addf %192, %193 : vector<8x128xf32>
    %195 = math.tanh %194 : vector<8x128xf32>
    %196 = arith.mulf %191, %195 : vector<8x128xf32>
    %c0_64 = arith.constant 0 : index
    %c5_65 = arith.constant 5 : index
    %c0_66 = arith.constant 0 : index
    %197 = vector.load %arg2[%c0_64, %c5_65, %c0_66] : memref<8x8x128xf32, #tpu.memory_space<vmem>>, vector<8x1x128xf32>
    %198 = vector.shape_cast %197 : vector<8x1x128xf32> to vector<8x128xf32>
    %199 = vector.shape_cast %196 : vector<8x128xf32> to vector<8x1x128xf32>
    tpu.vector_store %arg2[%c0_64, %c5_65, %c0_66], %199 {strides = array<i32>} : memref<8x8x128xf32, #tpu.memory_space<vmem>>, vector<8x1x128xf32>,
    %c6 = arith.constant 6 : index
    %c0_67 = arith.constant 0 : index
    %c0_68 = arith.constant 0 : index
    %200 = vector.load %arg0[%c6, %c0_67, %c0_68] : memref<8x8x512xf32, #tpu.memory_space<vmem>>, vector<1x8x512xf32>
    %201 = vector.shape_cast %200 : vector<1x8x512xf32> to vector<8x512xf32>
    %c0_69 = arith.constant 0 : index
    %c0_70 = arith.constant 0 : index
    %202 = vector.load %arg1[%c0_69, %c0_70] : memref<128x512xf32, #tpu.memory_space<vmem>>, vector<128x512xf32>
    %cst_71 = arith.constant dense<0.000000e+00> : vector<8x512xf32>
    %203 = tpu.matmul %196, %202, %cst_71 {dimension_numbers = #tpu.dot_dimension_numbers<[1], [0], [0], [1], [0, 0, 1, 1], [], []>} : vector<8x128xf32>, vector<128x512xf32>, vector<8x512xf32> -> vector<8x512xf32>
    %204 = arith.addf %201, %203 : vector<8x512xf32>
    %205 = vector.extract_strided_slice %204 {offsets = [0, 0], sizes = [8, 128], strides = [1, 1]} : vector<8x512xf32> to vector<8x128xf32>
    %206 = arith.negf %205 : vector<8x128xf32>
    %207 = math.exp %206 : vector<8x128xf32>
    %cst_72 = arith.constant 1.000000e+00 : f32
    %208 = vector.broadcast %cst_72 : f32 to vector<8x128xf32>
    %209 = arith.addf %208, %207 : vector<8x128xf32>
    %210 = arith.divf %208, %209 : vector<8x128xf32>
    %211 = vector.extract_strided_slice %204 {offsets = [0, 128], sizes = [8, 128], strides = [1, 1]} : vector<8x512xf32> to vector<8x128xf32>
    %212 = arith.negf %211 : vector<8x128xf32>
    %213 = math.exp %212 : vector<8x128xf32>
    %cst_73 = arith.constant 1.000000e+00 : f32
    %214 = vector.broadcast %cst_73 : f32 to vector<8x128xf32>
    %215 = arith.addf %214, %213 : vector<8x128xf32>
    %216 = arith.divf %214, %215 : vector<8x128xf32>
    %217 = vector.extract_strided_slice %204 {offsets = [0, 256], sizes = [8, 128], strides = [1, 1]} : vector<8x512xf32> to vector<8x128xf32>
    %218 = math.tanh %217 : vector<8x128xf32>
    %219 = vector.extract_strided_slice %204 {offsets = [0, 384], sizes = [8, 128], strides = [1, 1]} : vector<8x512xf32> to vector<8x128xf32>
    %220 = arith.negf %219 : vector<8x128xf32>
    %221 = math.exp %220 : vector<8x128xf32>
    %cst_74 = arith.constant 1.000000e+00 : f32
    %222 = vector.broadcast %cst_74 : f32 to vector<8x128xf32>
    %223 = arith.addf %222, %221 : vector<8x128xf32>
    %224 = arith.divf %222, %223 : vector<8x128xf32>
    %225 = arith.mulf %216, %194 : vector<8x128xf32>
    %226 = arith.mulf %210, %218 : vector<8x128xf32>
    %227 = arith.addf %225, %226 : vector<8x128xf32>
    %228 = math.tanh %227 : vector<8x128xf32>
    %229 = arith.mulf %224, %228 : vector<8x128xf32>
    %c0_75 = arith.constant 0 : index
    %c6_76 = arith.constant 6 : index
    %c0_77 = arith.constant 0 : index
    %230 = vector.load %arg2[%c0_75, %c6_76, %c0_77] : memref<8x8x128xf32, #tpu.memory_space<vmem>>, vector<8x1x128xf32>
    %231 = vector.shape_cast %230 : vector<8x1x128xf32> to vector<8x128xf32>
    %232 = vector.shape_cast %229 : vector<8x128xf32> to vector<8x1x128xf32>
    tpu.vector_store %arg2[%c0_75, %c6_76, %c0_77], %232 {strides = array<i32>} : memref<8x8x128xf32, #tpu.memory_space<vmem>>, vector<8x1x128xf32>,
    %c7 = arith.constant 7 : index
    %c0_78 = arith.constant 0 : index
    %c0_79 = arith.constant 0 : index
    %233 = vector.load %arg0[%c7, %c0_78, %c0_79] : memref<8x8x512xf32, #tpu.memory_space<vmem>>, vector<1x8x512xf32>
    %234 = vector.shape_cast %233 : vector<1x8x512xf32> to vector<8x512xf32>
    %c0_80 = arith.constant 0 : index
    %c0_81 = arith.constant 0 : index
    %235 = vector.load %arg1[%c0_80, %c0_81] : memref<128x512xf32, #tpu.memory_space<vmem>>, vector<128x512xf32>
    %cst_82 = arith.constant dense<0.000000e+00> : vector<8x512xf32>
    %236 = tpu.matmul %229, %235, %cst_82 {dimension_numbers = #tpu.dot_dimension_numbers<[1], [0], [0], [1], [0, 0, 1, 1], [], []>} : vector<8x128xf32>, vector<128x512xf32>, vector<8x512xf32> -> vector<8x512xf32>
    %237 = arith.addf %234, %236 : vector<8x512xf32>
    %238 = vector.extract_strided_slice %237 {offsets = [0, 0], sizes = [8, 128], strides = [1, 1]} : vector<8x512xf32> to vector<8x128xf32>
    %239 = arith.negf %238 : vector<8x128xf32>
    %240 = math.exp %239 : vector<8x128xf32>
    %cst_83 = arith.constant 1.000000e+00 : f32
    %241 = vector.broadcast %cst_83 : f32 to vector<8x128xf32>
    %242 = arith.addf %241, %240 : vector<8x128xf32>
    %243 = arith.divf %241, %242 : vector<8x128xf32>
    %244 = vector.extract_strided_slice %237 {offsets = [0, 128], sizes = [8, 128], strides = [1, 1]} : vector<8x512xf32> to vector<8x128xf32>
    %245 = arith.negf %244 : vector<8x128xf32>
    %246 = math.exp %245 : vector<8x128xf32>
    %cst_84 = arith.constant 1.000000e+00 : f32
    %247 = vector.broadcast %cst_84 : f32 to vector<8x128xf32>
    %248 = arith.addf %247, %246 : vector<8x128xf32>
    %249 = arith.divf %247, %248 : vector<8x128xf32>
    %250 = vector.extract_strided_slice %237 {offsets = [0, 256], sizes = [8, 128], strides = [1, 1]} : vector<8x512xf32> to vector<8x128xf32>
    %251 = math.tanh %250 : vector<8x128xf32>
    %252 = vector.extract_strided_slice %237 {offsets = [0, 384], sizes = [8, 128], strides = [1, 1]} : vector<8x512xf32> to vector<8x128xf32>
    %253 = arith.negf %252 : vector<8x128xf32>
    %254 = math.exp %253 : vector<8x128xf32>
    %cst_85 = arith.constant 1.000000e+00 : f32
    %255 = vector.broadcast %cst_85 : f32 to vector<8x128xf32>
    %256 = arith.addf %255, %254 : vector<8x128xf32>
    %257 = arith.divf %255, %256 : vector<8x128xf32>
    %258 = arith.mulf %249, %227 : vector<8x128xf32>
    %259 = arith.mulf %243, %251 : vector<8x128xf32>
    %260 = arith.addf %258, %259 : vector<8x128xf32>
    %261 = math.tanh %260 : vector<8x128xf32>
    %262 = arith.mulf %257, %261 : vector<8x128xf32>
    %c0_86 = arith.constant 0 : index
    %c7_87 = arith.constant 7 : index
    %c0_88 = arith.constant 0 : index
    %263 = vector.load %arg2[%c0_86, %c7_87, %c0_88] : memref<8x8x128xf32, #tpu.memory_space<vmem>>, vector<8x1x128xf32>
    %264 = vector.shape_cast %263 : vector<8x1x128xf32> to vector<8x128xf32>
    %265 = vector.shape_cast %262 : vector<8x128xf32> to vector<8x1x128xf32>
    tpu.vector_store %arg2[%c0_86, %c7_87, %c0_88], %265 {strides = array<i32>} : memref<8x8x128xf32, #tpu.memory_space<vmem>>, vector<8x1x128xf32>,
    return
  }
}

module attributes {stable_mosaic.version = 11 : i64} {
  func.func @_linear_head_kernel(%arg0: i32, %arg1: i32, %arg2: memref<64x128xf32, #tpu.memory_space<vmem>>, %arg3: memref<128x256xf32, #tpu.memory_space<vmem>>, %arg4: memref<1x256xf32, #tpu.memory_space<vmem>>, %arg5: memref<64x256xf32, #tpu.memory_space<vmem>>) attributes {dimension_semantics = [#tpu.dimension_semantics<parallel>, #tpu.dimension_semantics<parallel>], iteration_bounds = array<i64: 1, 1>, scalar_prefetch = 0 : i64, scratch_operands = 0 : i64, tpu.core_type = #tpu.core_type<tc>, window_params = [{transform_indices = @transform_0, window_bounds = array<i64: 64, 128>}, {transform_indices = @transform_1, window_bounds = array<i64: 128, 256>}, {transform_indices = @transform_2, window_bounds = array<i64: 1, 256>}, {transform_indices = @transform_3, window_bounds = array<i64: 64, 256>}]} {
    %c0 = arith.constant 0 : index
    %c0_0 = arith.constant 0 : index
    %0 = vector.load %arg2[%c0, %c0_0] : memref<64x128xf32, #tpu.memory_space<vmem>>, vector<64x128xf32>
    %c0_1 = arith.constant 0 : index
    %c0_2 = arith.constant 0 : index
    %1 = vector.load %arg3[%c0_1, %c0_2] : memref<128x256xf32, #tpu.memory_space<vmem>>, vector<128x256xf32>
    %cst = arith.constant dense<0.000000e+00> : vector<64x256xf32>
    %2 = tpu.matmul %0, %1, %cst {dimension_numbers = #tpu.dot_dimension_numbers<[1], [0], [0], [1], [0, 0, 1, 1], [], []>} : vector<64x128xf32>, vector<128x256xf32>, vector<64x256xf32> -> vector<64x256xf32>
    %c0_3 = arith.constant 0 : index
    %c0_4 = arith.constant 0 : index
    %3 = vector.load %arg4[%c0_3, %c0_4] : memref<1x256xf32, #tpu.memory_space<vmem>>, vector<1x256xf32>
    %4 = vector.broadcast %3 : vector<1x256xf32> to vector<64x256xf32>
    %5 = arith.addf %2, %4 : vector<64x256xf32>
    %c0_5 = arith.constant 0 : index
    %c0_6 = arith.constant 0 : index
    %6 = vector.load %arg5[%c0_5, %c0_6] : memref<64x256xf32, #tpu.memory_space<vmem>>, vector<64x256xf32>
    tpu.vector_store %arg5[%c0_5, %c0_6], %5 {strides = array<i32>} : memref<64x256xf32, #tpu.memory_space<vmem>>, vector<64x256xf32>,
    return
  }
  func.func @transform_0(%arg0: i32, %arg1: i32) -> (i32, i32) {
    %c0_i32 = arith.constant 0 : i32
    %c0_i32_0 = arith.constant 0 : i32
    return %arg1, %c0_i32 : i32, i32
  }
  func.func @transform_1(%arg0: i32, %arg1: i32) -> (i32, i32) {
    %c0_i32 = arith.constant 0 : i32
    %c0_i32_0 = arith.constant 0 : i32
    return %c0_i32, %arg0 : i32, i32
  }
  func.func @transform_2(%arg0: i32, %arg1: i32) -> (i32, i32) {
    %c0_i32 = arith.constant 0 : i32
    %c0_i32_0 = arith.constant 0 : i32
    return %c0_i32, %arg0 : i32, i32
  }
  func.func @transform_3(%arg0: i32, %arg1: i32) -> (i32, i32) {
    %c0_i32 = arith.constant 0 : i32
    return %arg1, %arg0 : i32, i32
  }
}

</mosaic_0001>

<bundles_post_ra>
// kernel: decoder_rnn_forward.3
= control target key start
LH: loop header
LB: loop body
LE: loop exit
PB: predicated region body
PF: predicated region fallthrough
CT: control target
= control target key end

     0   :  { %v288_v7 = vmov 0.0   ;;  %s455_s0 = inlined_call_operand.vmem [shape: f32[64,128], index: 0, kind: input, shape index: {}]   ;;  %s456_s1 = inlined_call_operand.vmem [shape: f32[128,256], index: 1, kind: input, shape index: {}]   ;;  %s457_s2 = inlined_call_operand.vmem [shape: f32[1,256], index: 2, kind: input, shape index: {}]   ;;  %s458_s3 = inlined_call_operand.hbm [shape: f32[64,256], index: 3, kind: output, shape index: {}]  }
   0x1   :  { %v24_v0 = vld [vmem:[%s456_s1 + $0x8] sm:$0xff]  ;;  %v26_v1 = vld [vmem:[%s456_s1 + $0x18] sm:$0xff]  ;;  %v23_v2 = vld [vmem:[%s456_s1] sm:$0xff]  ;;  %131 = vmatprep.mubr.f32.mxu0 %v288_v7  ;;  %155 = vmatprep.mubr.f32.mxu1 %v288_v7 }
   0x2   :  { %v212_v3 = vpack.c.bf16 %v26_v1, %v24_v0  ;;  %v25_v4 = vld [vmem:[%s456_s1 + $0x10] sm:$0xff]  ;;  %v28_v5 = vld [vmem:[%s456_s1 + $0x28] sm:$0xff]  ;;  %v30_v6 = vld [vmem:[%s456_s1 + $0x38] sm:$0xff] }
   0x3   :  { %v214_v8 = vpack.c.bf16 %v25_v4, %v23_v2  ;;  %v216_v9 = vpack.c.bf16 %v30_v6, %v28_v5  ;;  %v27_v10 = vld [vmem:[%s456_s1 + $0x20] sm:$0xff]  ;;  %v29_v11 = vld [vmem:[%s456_s1 + $0x30] sm:$0xff]  ;;  %v32_v12 = vld [vmem:[%s456_s1 + $0x48] sm:$0xff] }
   0x4   :  { %213 = vmatprep.subr.bf16.mxu0 %v212_v3  ;;  %244 = vmatprep.subr.bf16.mxu1 %v212_v3  ;;  %v34_v13 = vld [vmem:[%s456_s1 + $0x58] sm:$0xff]  ;;  %v218_v14 = vpack.c.bf16 %v29_v11, %v27_v10  ;;  %v31_v16 = vld [vmem:[%s456_s1 + $0x40] sm:$0xff]  ;;  %v33_v17 = vld [vmem:[%s456_s1 + $0x50] sm:$0xff] }
   0x5   :  { %215 = vmatpush1.bf16.msra.mxu0 %v214_v8  ;;  %252 = vmatpush1.bf16.msra.mxu1 %v214_v8  ;;  %v220_v15 = vpack.c.bf16 %v34_v13, %v32_v12  ;;  %v36_v18 = vld [vmem:[%s456_s1 + $0x68] sm:$0xff]  ;;  %v38_v19 = vld [vmem:[%s456_s1 + $0x78] sm:$0xff]  ;;  %v222_v20 = vpack.c.bf16 %v33_v17, %v31_v16  ;;  %v35_v22 = vld [vmem:[%s456_s1 + $0x60] sm:$0xff] }
   0x6   :  { %217 = vmatprep.subr.bf16.mxu0 %v216_v9  ;;  %245 = vmatprep.subr.bf16.mxu1 %v216_v9  ;;  %v224_v21 = vpack.c.bf16 %v38_v19, %v36_v18  ;;  %v37_v23 = vld [vmem:[%s456_s1 + $0x70] sm:$0xff]  ;;  %v40_v24 = vld [vmem:[%s456_s1 + $0x88] sm:$0xff]  ;;  %v42_v25 = vld [vmem:[%s456_s1 + $0x98] sm:$0xff] }
   0x7   :  { %v226_v26 = vpack.c.bf16 %v37_v23, %v35_v22  ;;  %v228_v27 = vpack.c.bf16 %v42_v25, %v40_v24  ;;  %v39_v28 = vld [vmem:[%s456_s1 + $0x80] sm:$0xff]  ;;  %v41_v29 = vld [vmem:[%s456_s1 + $0x90] sm:$0xff] }
   0x9   :  { %219 = vmatpush1.bf16.msra.mxu0 %v218_v14  ;;  %253 = vmatpush1.bf16.msra.mxu1 %v218_v14 }
   0xa   :  { %221 = vmatprep.subr.bf16.mxu0 %v220_v15  ;;  %246 = vmatprep.subr.bf16.mxu1 %v220_v15 }
   0xd   :  { %223 = vmatpush1.bf16.msra.mxu0 %v222_v20  ;;  %254 = vmatpush1.bf16.msra.mxu1 %v222_v20 }
   0xe   :  { %225 = vmatprep.subr.bf16.mxu0 %v224_v21  ;;  %247 = vmatprep.subr.bf16.mxu1 %v224_v21 }
   0xf   :  { %8 = vsyncpa [#allocation3], 0  ;;  %v44_v30 = vld [vmem:[%s456_s1 + $0xa8] sm:$0xff]  ;;  %v46_v31 = vld [vmem:[%s456_s1 + $0xb8] sm:$0xff]  ;;  %v230_v32 = vpack.c.bf16 %v41_v29, %v39_v28  ;;  %v57_v57 = vlaneseq }
  0x10   :  { %v232_v33 = vpack.c.bf16 %v46_v31, %v44_v30  ;;  %v43_v34 = vld [vmem:[%s456_s1 + $0xa0] sm:$0xff]  ;;  %v45_v35 = vld [vmem:[%s456_s1 + $0xb0] sm:$0xff]  ;;  %v48_v36 = vld [vmem:[%s456_s1 + $0xc8] sm:$0xff] }
  0x11   :  { %227 = vmatpush1.bf16.msra.mxu0 %v226_v26  ;;  %255 = vmatpush1.bf16.msra.mxu1 %v226_v26  ;;  %v50_v37 = vld [vmem:[%s456_s1 + $0xd8] sm:$0xff]  ;;  %v234_v38 = vpack.c.bf16 %v45_v35, %v43_v34  ;;  %v47_v40 = vld [vmem:[%s456_s1 + $0xc0] sm:$0xff]  ;;  %v49_v41 = vld [vmem:[%s456_s1 + $0xd0] sm:$0xff]  ;;  %v58_v58 = vshrl.u32 %v57_v57, 7 }
  0x12   :  { %229 = vmatprep.subr.bf16.mxu0 %v228_v27  ;;  %248 = vmatprep.subr.bf16.mxu1 %v228_v27  ;;  %v236_v39 = vpack.c.bf16 %v50_v37, %v48_v36  ;;  %v52_v42 = vld [vmem:[%s456_s1 + $0xe8] sm:$0xff]  ;;  %v54_v43 = vld [vmem:[%s456_s1 + $0xf8] sm:$0xff]  ;;  %v238_v44 = vpack.c.bf16 %v49_v41, %v47_v40  ;;  %v51_v46 = vld [vmem:[%s456_s1 + $0xe0] sm:$0xff] }
  0x13   :  { %v240_v45 = vpack.c.bf16 %v54_v43, %v52_v42  ;;  %v53_v47 = vld [vmem:[%s456_s1 + $0xf0] sm:$0xff]  ;;  %v15_v49 = vld [vmem:[%s455_s0] sm:$0xff]  ;;  %v16_v51 = vld [vmem:[%s455_s0 + $0x8] sm:$0xff]  ;;  %v59_v59 = vsub.s32 0, %v58_v58  ;;  %v63_v61 = vsub.s32 1, %v58_v58 }
  0x14   :  { %v242_v48 = vpack.c.bf16 %v53_v47, %v51_v46  ;;  %v19_v50 = vld [vmem:[%s455_s0 + $0x20] sm:$0xff]  ;;  %v20_v52 = vld [vmem:[%s455_s0 + $0x28] sm:$0xff]  ;;  %v17_v53 = vld [vmem:[%s455_s0 + $0x10] sm:$0xff] }
  0x15   :  { %231 = vmatpush1.bf16.msra.mxu0 %v230_v32  ;;  %256 = vmatpush1.bf16.msra.mxu1 %v230_v32  ;;  %v21_v54 = vld [vmem:[%s455_s0 + $0x30] sm:$0xff]  ;;  %v18_v55 = vld [vmem:[%s455_s0 + $0x18] sm:$0xff]  ;;  %v55_v60 = vld [vmem:[%s457_s2] sm:$0x3] }
  0x16   :  { %233 = vmatprep.subr.bf16.mxu0 %v232_v33  ;;  %249 = vmatprep.subr.bf16.mxu1 %v232_v33  ;;  %v22_v56 = vld [vmem:[%s455_s0 + $0x38] sm:$0xff]  ;;  %v60_v62 = vrot.slane %v55_v60, %v59_v59  ;;  %v64_v63 = vrot.slane %v55_v60, %v63_v61  ;;  %s289_s0 = smov [#allocation2]  }
  0x17   :  { %s201_s2 = sshll.u32 %s289_s0, 4  ;;  %s202_s2 = int_to_ptr.vmem [resolvable:$true] %s201_s2 }
  0x18   :  { %s264_s12 = scalar_lea.vmem %s202_s2, 2048  ;;  %p269_p1 = scmp.lt.s32.totalorder %s202_s2, %s202_s2 }
  0x19   :  { %235 = vmatpush1.bf16.msra.mxu0 %v234_v38  ;;  %257 = vmatpush1.bf16.msra.mxu1 %v234_v38  ;;  %p265_p0 = scmp.ne.s32.totalorder %s202_s2, %s264_s12  ;;  %p270_p2 = scmp.lt.s32.totalorder %s264_s12, %s264_s12 }
  0x1a   :  { %237 = vmatprep.subr.bf16.mxu0 %v236_v39  ;;  %250 = vmatprep.subr.bf16.mxu1 %v236_v39 }
  0x1b   :  { %p271_p3 = por %p270_p2, %p269_p1 }
  0x1d   :  { %239 = vmatpush1.bf16.msra.mxu0 %v238_v44  ;;  %258 = vmatpush1.bf16.msra.mxu1 %v238_v44  ;;  %p272_p4 = pnand %p271_p3, %p265_p0 }
  0x1e   :  { %241 = vmatprep.subr.bf16.mxu0 %v240_v45  ;;  %251 = vmatprep.subr.bf16.mxu1 %v240_v45 }
  0x21   :  { %243 = vmatpush1.bf16.msra.mxu0 %v242_v48  ;;  %259 = vmatpush1.bf16.msra.mxu1 %v242_v48 }
  0x24   :  { %132 = vmatmul.mubr.f32.vlgmr.msra.gmra.mrb[0].mxu0 %v15_v49  ;;  %156 = vmatmul.mubr.f32.vlgmr.msra.gmra.mrb[0].mxu1 %v19_v50 }
  0x25   :  { %137 = vmatprep.mubr.f32.mxu0 %v288_v7  ;;  %161 = vmatprep.mubr.f32.mxu1 %v288_v7 }
  0x28   :  { %138 = vmatmul.mubr.f32.gmra.mrb[2].mxu0 %v16_v51  ;;  %162 = vmatmul.mubr.f32.gmra.mrb[2].mxu1 %v20_v52 }
  0x29   :  { %143 = vmatprep.mubr.f32.mxu0 %v288_v7  ;;  %167 = vmatprep.mubr.f32.mxu1 %v288_v7 }
  0x2c   :  { %144 = vmatmul.mubr.f32.gmra.mrb[4].mxu0 %v17_v53  ;;  %168 = vmatmul.mubr.f32.gmra.mrb[4].mxu1 %v21_v54 }
  0x2d   :  { %149 = vmatprep.mubr.f32.mxu0 %v288_v7  ;;  %173 = vmatprep.mubr.f32.mxu1 %v288_v7 }
  0x30   :  { %150 = vmatmul.mubr.f32.gmra.mrb[6].mxu0 %v18_v55  ;;  %174 = vmatmul.mubr.f32.gmra.mrb[6].mxu1 %v22_v56 }
  0xf7   :  { %v133_v0 = vpop.f32.mrb[0].mxu0  ;;  %v157_v1 = vpop.f32.mrb[0].mxu1 }
  0xf8   :  { %v134_v2 = vadd.f32 %v133_v0, %v60_v62  ;;  %v158_v3 = vadd.f32 %v157_v1, %v60_v62  ;;  %v135_v4 = vpop.f32.mrb[1].mxu0  ;;  %v159_v5 = vpop.f32.mrb[1].mxu1 }
  0xf9   :  { %v136_v6 = vadd.f32 %v135_v4, %v64_v63  ;;  %v160_v7 = vadd.f32 %v159_v5, %v64_v63 }
  0xfa   :  { %180 = vst [vmem:[#allocation2] sm:$0xff] %v134_v2  ;;  %188 = vst [vmem:[#allocation2 + $0x40] sm:$0xff] %v158_v3 }
  0xfb   :  { %181 = vst [vmem:[#allocation2 + $0x8] sm:$0xff] %v136_v6  ;;  %189 = vst [vmem:[#allocation2 + $0x48] sm:$0xff] %v160_v7  ;;  %v139_v8 = vpop.f32.mrb[2].mxu0  ;;  %v163_v9 = vpop.f32.mrb[2].mxu1 }
  0xfc   :  { %v140_v10 = vadd.f32 %v139_v8, %v60_v62  ;;  %v164_v11 = vadd.f32 %v163_v9, %v60_v62  ;;  %v141_v12 = vpop.f32.mrb[3].mxu0  ;;  %v165_v13 = vpop.f32.mrb[3].mxu1 }
  0xfd   :  { %v142_v14 = vadd.f32 %v141_v12, %v64_v63  ;;  %v166_v15 = vadd.f32 %v165_v13, %v64_v63 }
  0xfe   :  { %182 = vst [vmem:[#allocation2 + $0x10] sm:$0xff] %v140_v10  ;;  %190 = vst [vmem:[#allocation2 + $0x50] sm:$0xff] %v164_v11 }
  0xff   :  { %183 = vst [vmem:[#allocation2 + $0x18] sm:$0xff] %v142_v14  ;;  %191 = vst [vmem:[#allocation2 + $0x58] sm:$0xff] %v166_v15  ;;  %v145_v16 = vpop.f32.mrb[4].mxu0  ;;  %v169_v17 = vpop.f32.mrb[4].mxu1 }
 0x100   :  { %v146_v18 = vadd.f32 %v145_v16, %v60_v62  ;;  %v170_v19 = vadd.f32 %v169_v17, %v60_v62  ;;  %v147_v20 = vpop.f32.mrb[5].mxu0  ;;  %v171_v21 = vpop.f32.mrb[5].mxu1 }
 0x101   :  { %v148_v22 = vadd.f32 %v147_v20, %v64_v63  ;;  %v172_v23 = vadd.f32 %v171_v21, %v64_v63 }
 0x102   :  { %184 = vst [vmem:[#allocation2 + $0x20] sm:$0xff] %v146_v18  ;;  %192 = vst [vmem:[#allocation2 + $0x60] sm:$0xff] %v170_v19 }
 0x103   :  { %185 = vst [vmem:[#allocation2 + $0x28] sm:$0xff] %v148_v22  ;;  %193 = vst [vmem:[#allocation2 + $0x68] sm:$0xff] %v172_v23  ;;  %v151_v24 = vpop.f32.mrb[6].mxu0  ;;  %v175_v25 = vpop.f32.mrb[6].mxu1 }
 0x104   :  { %v152_v26 = vadd.f32 %v151_v24, %v60_v62  ;;  %v176_v27 = vadd.f32 %v175_v25, %v60_v62  ;;  %v153_v28 = vpop.f32.mrb[7].mxu0  ;;  %v177_v29 = vpop.f32.mrb[7].mxu1 }
 0x105   :  { %v154_v30 = vadd.f32 %v153_v28, %v64_v63  ;;  %v178_v31 = vadd.f32 %v177_v29, %v64_v63 }
 0x106   :  { %186 = vst [vmem:[#allocation2 + $0x30] sm:$0xff] %v152_v26  ;;  %194 = vst [vmem:[#allocation2 + $0x70] sm:$0xff] %v176_v27 }
 0x107   :  { %187 = vst [vmem:[#allocation2 + $0x38] sm:$0xff] %v154_v30  ;;  %195 = vst [vmem:[#allocation2 + $0x78] sm:$0xff] %v178_v31 }
 0x108   :  { %275 = shalt.err (!%p272_p4)
}
 0x109   :  { %s276_s15 = scalar_lea.hbm %s458_s3, 2048 }
 0x10a   :  { %p277_p5 = scmp.ne.s32.totalorder %s458_s3, %s276_s15  ;;  %p280_p6 = scmp.lt.u32.totalorder %s276_s15, %s458_s3 }
 0x10c   :  { %p282_p7 = pnand %p280_p6, %p277_p5 }
 0x10e   :  { %285 = shalt.err (!%p282_p7)
}
 0x10f   :  { %s290_s20 = smov 256   ;;  %s291_s21 = smov 16  }
 0x110   :  { %207 = dma.vmem_to_hbm [thread:$0]  %s202_s2, 2048, %s458_s3, [#allocation3], %s290_s20, %s290_s20, %s291_s21  }
 0x111   :  { %286 = dma.done.wait [#allocation3], 2048  }
 0x112   :  { %287 = vsyncadd [#allocation3], 4294965248 }
 0x113   :  { %211 = vsyncpa [#allocation3], 1 }

// kernel: decoder_rnn_forward.2
= control target key start
LH: loop header
LB: loop body
LE: loop exit
PB: predicated region body
PF: predicated region fallthrough
CT: control target
= control target key end

     0   :  { %v3180_v3 = vmov 0.0   ;;  %s4568_s1 = inlined_call_operand.vmem [shape: f32[128,512], index: 1, kind: input, shape index: {}]   ;;  %s4569_s0 = inlined_call_operand.vmem [shape: f32[8,8,512], index: 0, kind: input, shape index: {}]   ;;  %s4570_s2 = inlined_call_operand.vmem [shape: f32[8,8,128], index: 2, kind: output, shape index: {}]  }
   0x1   :  { %v16_v0 = vld [vmem:[%s4568_s1 + $0x8] sm:$0xff]  ;;  %v15_v2 = vld [vmem:[%s4568_s1] sm:$0xff]  ;;  %143 = vmatprep.mubr.f32.mxu0 %v3180_v3  ;;  %214 = vmatprep.mubr.f32.mxu1 %v3180_v3  ;;  %v18_v19 = vld [vmem:[%s4568_s1 + $0x18] sm:$0xff] }
   0x2   :  { %v20_v1 = vld [vmem:[%s4568_s1 + $0x28] sm:$0xff]  ;;  %v19_v5 = vld [vmem:[%s4568_s1 + $0x20] sm:$0xff]  ;;  %v22_v20 = vld [vmem:[%s4568_s1 + $0x38] sm:$0xff] }
   0x3   :  { %v3208_v4 = vpack.c.bf16 %v20_v1, %v16_v0  ;;  %v24_v6 = vld [vmem:[%s4568_s1 + $0x48] sm:$0xff]  ;;  %v3219_v8 = vpack.c.bf16 %v19_v5, %v15_v2  ;;  %v23_v10 = vld [vmem:[%s4568_s1 + $0x40] sm:$0xff]  ;;  %v3260_v22 = vpack.c.bf16 %v22_v20, %v18_v19  ;;  %v17_v23 = vld [vmem:[%s4568_s1 + $0x10] sm:$0xff] }
   0x4   :  { %v28_v7 = vld [vmem:[%s4568_s1 + $0x68] sm:$0xff]  ;;  %v27_v11 = vld [vmem:[%s4568_s1 + $0x60] sm:$0xff]  ;;  %v21_v24 = vld [vmem:[%s4568_s1 + $0x30] sm:$0xff] }
   0x5   :  { %v3221_v9 = vpack.c.bf16 %v28_v7, %v24_v6  ;;  %v32_v12 = vld [vmem:[%s4568_s1 + $0x88] sm:$0xff]  ;;  %2539 = vmatprep.subr.bf16.mxu0 %v3208_v4  ;;  %v3237_v14 = vpack.c.bf16 %v27_v11, %v23_v10  ;;  %v31_v15 = vld [vmem:[%s4568_s1 + $0x80] sm:$0xff]  ;;  %v3268_v25 = vpack.c.bf16 %v21_v24, %v17_v23  ;;  %2571 = vmatprep.subr.bf16.mxu1 %v3260_v22  ;;  %v26_v27 = vld [vmem:[%s4568_s1 + $0x58] sm:$0xff] }
   0x6   :  { %v36_v13 = vld [vmem:[%s4568_s1 + $0xa8] sm:$0xff]  ;;  %2541 = vmatpush1.bf16.msra.mxu0 %v3219_v8  ;;  %v35_v16 = vld [vmem:[%s4568_s1 + $0xa0] sm:$0xff]  ;;  %v30_v28 = vld [vmem:[%s4568_s1 + $0x78] sm:$0xff] }
   0x7   :  { %2543 = vmatprep.subr.bf16.mxu0 %v3221_v9  ;;  %v3246_v17 = vpack.c.bf16 %v36_v13, %v32_v12  ;;  %v40_v18 = vld [vmem:[%s4568_s1 + $0xc8] sm:$0xff]  ;;  %v3271_v26 = vpack.c.bf16 %v35_v16, %v31_v15  ;;  %v25_v29 = vld [vmem:[%s4568_s1 + $0x50] sm:$0xff]  ;;  %v39_v31 = vld [vmem:[%s4568_s1 + $0xc0] sm:$0xff]  ;;  %2573 = vmatpush1.bf16.msra.mxu1 %v3268_v25  ;;  %v3293_v33 = vpack.c.bf16 %v30_v28, %v26_v27 }
   0x8   :  { %v44_v21 = vld [vmem:[%s4568_s1 + $0xe8] sm:$0xff]  ;;  %v43_v32 = vld [vmem:[%s4568_s1 + $0xe0] sm:$0xff]  ;;  %v29_v34 = vld [vmem:[%s4568_s1 + $0x70] sm:$0xff] }
   0x9   :  { %v3284_v30 = vpack.c.bf16 %v44_v21, %v40_v18  ;;  %v48_v35 = vld [vmem:[%s4568_s1 + $0x108] sm:$0xff]  ;;  %v3304_v37 = vpack.c.bf16 %v29_v34, %v25_v29  ;;  %v34_v38 = vld [vmem:[%s4568_s1 + $0x98] sm:$0xff]  ;;  %2575 = vmatprep.subr.bf16.mxu1 %v3293_v33  ;;  %v33_v40 = vld [vmem:[%s4568_s1 + $0x90] sm:$0xff]  ;;  %v3320_v42 = vpack.c.bf16 %v43_v32, %v39_v31 }
   0xa   :  { %2545 = vmatpush1.bf16.msra.mxu0 %v3237_v14  ;;  %v52_v36 = vld [vmem:[%s4568_s1 + $0x128] sm:$0xff]  ;;  %v38_v39 = vld [vmem:[%s4568_s1 + $0xb8] sm:$0xff]  ;;  %v37_v41 = vld [vmem:[%s4568_s1 + $0xb0] sm:$0xff] }
   0xb   :  { %2547 = vmatprep.subr.bf16.mxu0 %v3246_v17  ;;  %v47_v43 = vld [vmem:[%s4568_s1 + $0x100] sm:$0xff]  ;;  %v3328_v45 = vpack.c.bf16 %v38_v39, %v34_v38  ;;  %v3331_v46 = vpack.c.bf16 %v52_v36, %v48_v35  ;;  %2577 = vmatpush1.bf16.msra.mxu1 %v3304_v37  ;;  %v56_v47 = vld [vmem:[%s4568_s1 + $0x148] sm:$0xff]  ;;  %v3337_v48 = vpack.c.bf16 %v37_v41, %v33_v40  ;;  %v42_v49 = vld [vmem:[%s4568_s1 + $0xd8] sm:$0xff] }
   0xc   :  { %v51_v44 = vld [vmem:[%s4568_s1 + $0x120] sm:$0xff]  ;;  %v46_v50 = vld [vmem:[%s4568_s1 + $0xf8] sm:$0xff]  ;;  %v60_v51 = vld [vmem:[%s4568_s1 + $0x168] sm:$0xff] }
   0xd   :  { %2579 = vmatprep.subr.bf16.mxu1 %v3328_v45  ;;  %v3349_v52 = vpack.c.bf16 %v46_v50, %v42_v49  ;;  %v41_v53 = vld [vmem:[%s4568_s1 + $0xd0] sm:$0xff]  ;;  %v3358_v55 = vpack.c.bf16 %v51_v44, %v47_v43  ;;  %v50_v56 = vld [vmem:[%s4568_s1 + $0x118] sm:$0xff]  ;;  %v3367_v58 = vpack.c.bf16 %v60_v51, %v56_v47  ;;  %v55_v59 = vld [vmem:[%s4568_s1 + $0x140] sm:$0xff] }
   0xe   :  { %2549 = vmatpush1.bf16.msra.mxu0 %v3271_v26  ;;  %v45_v54 = vld [vmem:[%s4568_s1 + $0xf0] sm:$0xff]  ;;  %v54_v57 = vld [vmem:[%s4568_s1 + $0x138] sm:$0xff]  ;;  %v59_v60 = vld [vmem:[%s4568_s1 + $0x160] sm:$0xff] }
   0xf   :  { %2551 = vmatprep.subr.bf16.mxu0 %v3284_v30  ;;  %2581 = vmatpush1.bf16.msra.mxu1 %v3337_v48  ;;  %v64_v61 = vld [vmem:[%s4568_s1 + $0x188] sm:$0xff]  ;;  %v3379_v62 = vpack.c.bf16 %v45_v54, %v41_v53  ;;  %v3385_v0 = vpack.c.bf16 %v54_v57, %v50_v56  ;;  %v49_v1 = vld [vmem:[%s4568_s1 + $0x110] sm:$0xff]  ;;  %v58_v5 = vld [vmem:[%s4568_s1 + $0x158] sm:$0xff]  ;;  %v3400_v7 = vpack.c.bf16 %v59_v60, %v55_v59 }
  0x10   :  { %v68_v63 = vld [vmem:[%s4568_s1 + $0x1a8] sm:$0xff]  ;;  %2583 = vmatprep.subr.bf16.mxu1 %v3349_v52  ;;  %v53_v2 = vld [vmem:[%s4568_s1 + $0x130] sm:$0xff]  ;;  %v62_v6 = vld [vmem:[%s4568_s1 + $0x178] sm:$0xff] }
  0x11   :  { %v3403_v10 = vpack.c.bf16 %v68_v63, %v64_v61  ;;  %v63_v11 = vld [vmem:[%s4568_s1 + $0x180] sm:$0xff]  ;;  %v72_v13 = vld [vmem:[%s4568_s1 + $0x1c8] sm:$0xff]  ;;  %v3415_v15 = vpack.c.bf16 %v53_v2, %v49_v1  ;;  %v3421_v18 = vpack.c.bf16 %v62_v6, %v58_v5  ;;  %v57_v19 = vld [vmem:[%s4568_s1 + $0x150] sm:$0xff] }
  0x12   :  { %2553 = vmatpush1.bf16.msra.mxu0 %v3320_v42  ;;  %v67_v12 = vld [vmem:[%s4568_s1 + $0x1a0] sm:$0xff]  ;;  %v76_v16 = vld [vmem:[%s4568_s1 + $0x1e8] sm:$0xff]  ;;  %v61_v20 = vld [vmem:[%s4568_s1 + $0x170] sm:$0xff] }
  0x13   :  { %2555 = vmatprep.subr.bf16.mxu0 %v3331_v46  ;;  %2585 = vmatpush1.bf16.msra.mxu1 %v3379_v62  ;;  %v66_v21 = vld [vmem:[%s4568_s1 + $0x198] sm:$0xff]  ;;  %v3436_v24 = vpack.c.bf16 %v67_v12, %v63_v11  ;;  %v3439_v27 = vpack.c.bf16 %v76_v16, %v72_v13  ;;  %v71_v28 = vld [vmem:[%s4568_s1 + $0x1c0] sm:$0xff]  ;;  %v3448_v31 = vpack.c.bf16 %v61_v20, %v57_v19  ;;  %v65_v34 = vld [vmem:[%s4568_s1 + $0x190] sm:$0xff] }
  0x14   :  { %2587 = vmatprep.subr.bf16.mxu1 %v3385_v0  ;;  %v70_v23 = vld [vmem:[%s4568_s1 + $0x1b8] sm:$0xff]  ;;  %v75_v29 = vld [vmem:[%s4568_s1 + $0x1e0] sm:$0xff]  ;;  %v69_v35 = vld [vmem:[%s4568_s1 + $0x1b0] sm:$0xff] }
  0x15   :  { %v3451_v32 = vpack.c.bf16 %v70_v23, %v66_v21  ;;  %v74_v36 = vld [vmem:[%s4568_s1 + $0x1d8] sm:$0xff]  ;;  %v3466_v39 = vpack.c.bf16 %v75_v29, %v71_v28  ;;  %v3470_v40 = vpack.c.bf16 %v69_v35, %v65_v34  ;;  %v73_v43 = vld [vmem:[%s4568_s1 + $0x1d0] sm:$0xff]  ;;  %v11_v49 = vld [vmem:[%s4569_s0] sm:$0xff]  ;;  %v3181_v35 = vmov 1966171168  }
  0x16   :  { %2557 = vmatpush1.bf16.msra.mxu0 %v3358_v55  ;;  %v78_v38 = vld [vmem:[%s4568_s1 + $0x1f8] sm:$0xff]  ;;  %v77_v44 = vld [vmem:[%s4568_s1 + $0x1f0] sm:$0xff]  ;;  %v12_v50 = vld [vmem:[%s4569_s0 + $0x8] sm:$0xff] }
  0x17   :  { %2559 = vmatprep.subr.bf16.mxu0 %v3367_v58  ;;  %2589 = vmatpush1.bf16.msra.mxu1 %v3415_v15  ;;  %v3473_v41 = vpack.c.bf16 %v78_v38, %v74_v36  ;;  %v3483_v47 = vpack.c.bf16 %v77_v44, %v73_v43  ;;  %v14_v59 = vld [vmem:[%s4569_s0 + $0x18] sm:$0xff]  ;;  %v13_v1 = vld [vmem:[%s4569_s0 + $0x10] sm:$0xff]  ;;  %v252_v36 = vunpack.c.l.s4 %v3181_v35  ;;  %v254_v38 = vlaneseq }
  0x18   :  { %2591 = vmatprep.subr.bf16.mxu1 %v3421_v18 }
  0x19   :  { %v253_v43 = vunpack.c.0.s8 %v252_v36  ;;  %v255_v44 = vshrl.u32 %v254_v38, 7 }
  0x1a   :  { %2561 = vmatpush1.bf16.msra.mxu0 %v3400_v7 }
  0x1b   :  { %2563 = vmatprep.subr.bf16.mxu0 %v3403_v10  ;;  %2593 = vmatpush1.bf16.msra.mxu1 %v3448_v31 }
  0x1c   :  { %2595 = vmatprep.subr.bf16.mxu1 %v3451_v32 }
  0x1e   :  { %2565 = vmatpush1.bf16.msra.mxu0 %v3436_v24 }
  0x1f   :  { %2567 = vmatprep.subr.bf16.mxu0 %v3439_v27  ;;  %2597 = vmatpush1.bf16.msra.mxu1 %v3470_v40 }
  0x20   :  { %2599 = vmatprep.subr.bf16.mxu1 %v3473_v41 }
  0x22   :  { %2569 = vmatpush1.bf16.msra.mxu0 %v3466_v39 }
  0x23   :  { %2603 = vmatprep.subr.bf16.mxu0 %v3208_v4  ;;  %2601 = vmatpush1.bf16.msra.mxu1 %v3483_v47 }
  0x24   :  { %2635 = vmatprep.subr.bf16.mxu1 %v3260_v22 }
  0x25   :  { %144 = vmatmul.mubr.f32.vlgmr.msra.gmra.mrb[0].mxu0 %v3180_v3 }
  0x26   :  { %2605 = vmatpush1.bf16.msra.mxu0 %v3219_v8  ;;  %448 = vmatprep.mubr.f32.mxu0 %v3180_v3 }
  0x27   :  { %2607 = vmatprep.subr.bf16.mxu0 %v3221_v9  ;;  %215 = vmatmul.mubr.f32.vlgmr.msra.gmra.mrb[0].mxu1 %v3180_v3 }
  0x28   :  { %2637 = vmatpush1.bf16.msra.mxu1 %v3268_v25  ;;  %519 = vmatprep.mubr.f32.mxu1 %v3180_v3 }
  0x29   :  { %2639 = vmatprep.subr.bf16.mxu1 %v3293_v33 }
  0x2a   :  { %2609 = vmatpush1.bf16.msra.mxu0 %v3237_v14 }
  0x2b   :  { %2611 = vmatprep.subr.bf16.mxu0 %v3246_v17 }
  0x2c   :  { %2641 = vmatpush1.bf16.msra.mxu1 %v3304_v37 }
  0x2d   :  { %2643 = vmatprep.subr.bf16.mxu1 %v3328_v45 }
  0x2e   :  { %2613 = vmatpush1.bf16.msra.mxu0 %v3271_v26 }
  0x2f   :  { %2615 = vmatprep.subr.bf16.mxu0 %v3284_v30 }
  0x30   :  { %2645 = vmatpush1.bf16.msra.mxu1 %v3337_v48 }
  0x31   :  { %2647 = vmatprep.subr.bf16.mxu1 %v3349_v52 }
  0x32   :  { %2617 = vmatpush1.bf16.msra.mxu0 %v3320_v42 }
  0x33   :  { %2619 = vmatprep.subr.bf16.mxu0 %v3331_v46 }
  0x34   :  { %2649 = vmatpush1.bf16.msra.mxu1 %v3379_v62 }
  0x35   :  { %2651 = vmatprep.subr.bf16.mxu1 %v3385_v0 }
  0x36   :  { %2621 = vmatpush1.bf16.msra.mxu0 %v3358_v55 }
  0x37   :  { %2623 = vmatprep.subr.bf16.mxu0 %v3367_v58 }
  0x38   :  { %2653 = vmatpush1.bf16.msra.mxu1 %v3415_v15 }
  0x39   :  { %2655 = vmatprep.subr.bf16.mxu1 %v3421_v18 }
  0x3a   :  { %2625 = vmatpush1.bf16.msra.mxu0 %v3400_v7 }
  0x3b   :  { %2627 = vmatprep.subr.bf16.mxu0 %v3403_v10 }
  0x3c   :  { %2657 = vmatpush1.bf16.msra.mxu1 %v3448_v31 }
  0x3d   :  { %2659 = vmatprep.subr.bf16.mxu1 %v3451_v32 }
  0x3e   :  { %2629 = vmatpush1.bf16.msra.mxu0 %v3436_v24 }
  0x3f   :  { %2631 = vmatprep.subr.bf16.mxu0 %v3439_v27 }
  0x40   :  { %2661 = vmatpush1.bf16.msra.mxu1 %v3470_v40 }
  0x41   :  { %2663 = vmatprep.subr.bf16.mxu1 %v3473_v41 }
  0x42   :  { %2633 = vmatpush1.bf16.msra.mxu0 %v3466_v39 }
  0x43   :  { %2667 = vmatprep.subr.bf16.mxu0 %v3208_v4 }
  0x44   :  { %2665 = vmatpush1.bf16.msra.mxu1 %v3483_v47 }
  0x45   :  { %2699 = vmatprep.subr.bf16.mxu1 %v3260_v22 }
  0xf8   :  { %v145_v51 = vpop.f32.mrb[0].mxu0 }
  0xf9   :  { %v221_v53 = vadd.f32 %v145_v51, %v11_v49  ;;  %v147_v54 = vpop.f32.mrb[1].mxu0 }
  0xfa   :  { %v222_v56 = vadd.f32 %v147_v54, %v12_v50  ;;  %v216_v60 = vpop.f32.mrb[0].mxu1  ;;  %v3540_v50 = vsub.s32 %v253_v43, %v255_v44 }
  0xfb   :  { %v2454_v57 = vmul.f32 -1.442695, %v221_v53  ;;  %v218_v61 = vpop.f32.mrb[1].mxu1  ;;  %v223_v5 = vadd.f32 %v216_v60, %v13_v1 }
  0xfc   :  { %v2455_v4 = vmul.f32 -1.442695, %v222_v56  ;;  %v224_v63 = vadd.f32 %v218_v61, %v14_v59 }
  0xfd   :  { %3052 = vpow2.f32 %v2454_v57 }
  0xfe   :  { %3054 = vpow2.f32 %v2455_v4  ;;  %v2456_v2 = vmul.f32 -1.442695, %v224_v63 }
 0x100   :  { %3056 = vpow2.f32 %v2456_v2 }
 0x101   :  { %3058 = vtanh.f32 %v223_v5 }
 0x107   :  { %v3053_v6 = vpop.eup %3052 }
 0x108   :  { %v3055_v11 = vpop.eup %3054  ;;  %v228_v12 = vadd.f32 1.0, %v3053_v6 }
 0x109   :  { %v234_v13 = vadd.f32 1.0, %v3055_v11 }
 0x10a   :  { %3060 = vrcp.f32 %v228_v12  ;;  %v3057_v16 = vpop.eup %3056 }
 0x10b   :  { %3062 = vrcp.f32 %v234_v13  ;;  %v3059_v19 = vpop.eup %3058  ;;  %v241_v21 = vadd.f32 1.0, %v3057_v16 }
 0x10d   :  { %3064 = vrcp.f32 %v241_v21 }
 0x114   :  { %v3061_v20 = vpop.eup %3060 }
 0x115   :  { %v3063_v23 = vpop.eup %3062  ;;  %v245_v28 = vmul.f32 %v3061_v20, %v3059_v19 }
 0x116   :  { %v244_v29 = vmul.f32 0.0, %v3063_v23 }
 0x117   :  { %v3065_v49 = vpop.eup %3064 }
 0x118   :  { %v3537_v34 = vadd.f32 %v245_v28, %v244_v29 }
 0x11a   :  { %3066 = vtanh.f32 %v3537_v34 }
 0x124   :  { %v3067_v51 = vpop.eup %3066 }
 0x125   :  { %v248_v53 = vmul.f32 %v3067_v51, %v3065_v49 }
 0x127   :  { %v250_v54 = vcombine.high %v248_v53, %v248_v53  ;;  %v257_v56 = vrot.slane %v248_v53, %v3540_v50  ;;  %449 = vmatmul.mubr.f32.vlgmr.msra.gmra.mrb[2].mxu0 %v248_v53  ;;  %520 = vmatmul.mubr.f32.vlgmr.msra.gmra.mrb[2].mxu1 %v248_v53 }
 0x128   :  { %2669 = vmatpush1.bf16.msra.mxu0 %v3219_v8  ;;  %2701 = vmatpush1.bf16.msra.mxu1 %v3268_v25 }
 0x129   :  { %v264_v57 = vrot.slane %v250_v54, %v3540_v50  ;;  %v265_v4 = vcombine.high %v257_v56, %v257_v56  ;;  %v273_v59 = vrot.slane %v257_v56, %v3540_v50  ;;  %2457 = vst.sshfl [vmem:[%s4570_s2] sm:$0x1 pattern:$0x73625140] %v257_v56  ;;  %2671 = vmatprep.subr.bf16.mxu0 %v3221_v9 }
 0x12a   :  { %2703 = vmatprep.subr.bf16.mxu1 %v3293_v33  ;;  %753 = vmatprep.mubr.f32.mxu0 %v3180_v3 }
 0x12b   :  { %824 = vmatprep.mubr.f32.mxu1 %v3180_v3  ;;  %v266_v8 = vcombine.high %v264_v57, %v264_v57  ;;  %v280_v60 = vrot.slane %v264_v57, %v3540_v50  ;;  %v287_v61 = vrot.slane %v265_v4, %v3540_v50  ;;  %v295_v63 = vcombine.high %v273_v59, %v273_v59  ;;  %v942_v59 = vld [vmem:[%s4568_s1 + $0x60] sm:$0xff] }
 0x12c   :  { %2458 = vst.sshfl [vmem:[%s4570_s2 + $0x8] sm:$0x1 pattern:$0x73625140] %v265_v4  ;;  %2673 = vmatpush1.bf16.msra.mxu0 %v3237_v14  ;;  %2705 = vmatpush1.bf16.msra.mxu1 %v3304_v37  ;;  %v2461_v14 = vld [vmem:[%s4569_s0 + $0x20] sm:$0xff] }
 0x12d   :  { %2459 = vst.sshfl [vmem:[%s4570_s2 + $0x20] sm:$0x1 pattern:$0x73625140] %v264_v57  ;;  %v294_v9 = vrot.slane %v266_v8, %v3540_v50  ;;  %v296_v1 = vcombine.high %v280_v60, %v280_v60  ;;  %v297_v2 = vcombine.high %v287_v61, %v287_v61  ;;  %309 = vst [vmem:[%s4570_s2 + $0x10] sm:$0x1] %v295_v63  ;;  %2675 = vmatprep.subr.bf16.mxu0 %v3246_v17 }
 0x12e   :  { %2460 = vst.sshfl [vmem:[%s4570_s2 + $0x28] sm:$0x1 pattern:$0x73625140] %v266_v8  ;;  %2707 = vmatprep.subr.bf16.mxu1 %v3328_v45  ;;  %v2462_v17 = vld [vmem:[%s4569_s0 + $0x28] sm:$0xff]  ;;  %v938_v4 = vld [vmem:[%s4568_s1 + $0x40] sm:$0xff] }
 0x12f   :  { %v298_v5 = vcombine.high %v294_v9, %v294_v9  ;;  %310 = vst [vmem:[%s4570_s2 + $0x18] sm:$0x1] %v297_v2  ;;  %313 = vst [vmem:[%s4570_s2 + $0x30] sm:$0x1] %v296_v1  ;;  %v3695_v8 = vpack.c.bf16 %v942_v59, %v938_v4  ;;  %v947_v60 = vld [vmem:[%s4568_s1 + $0x88] sm:$0xff]  ;;  %v946_v9 = vld [vmem:[%s4568_s1 + $0x80] sm:$0xff] }
 0x130   :  { %2677 = vmatpush1.bf16.msra.mxu0 %v3271_v26  ;;  %2709 = vmatpush1.bf16.msra.mxu1 %v3337_v48  ;;  %v951_v61 = vld [vmem:[%s4568_s1 + $0xa8] sm:$0xff]  ;;  %v950_v1 = vld [vmem:[%s4568_s1 + $0xa0] sm:$0xff] }
 0x131   :  { %314 = vst [vmem:[%s4570_s2 + $0x38] sm:$0x1] %v298_v5  ;;  %2679 = vmatprep.subr.bf16.mxu0 %v3284_v30  ;;  %2711 = vmatprep.subr.bf16.mxu1 %v3349_v52  ;;  %v3705_v63 = vpack.c.bf16 %v951_v61, %v947_v60  ;;  %v3713_v2 = vpack.c.bf16 %v950_v1, %v946_v9  ;;  %v955_v5 = vld [vmem:[%s4568_s1 + $0xc8] sm:$0xff] }
 0x134   :  { %2681 = vmatpush1.bf16.msra.mxu0 %v3320_v42  ;;  %2713 = vmatpush1.bf16.msra.mxu1 %v3379_v62 }
 0x135   :  { %2683 = vmatprep.subr.bf16.mxu0 %v3331_v46  ;;  %2715 = vmatprep.subr.bf16.mxu1 %v3385_v0 }
 0x138   :  { %2685 = vmatpush1.bf16.msra.mxu0 %v3358_v55  ;;  %2717 = vmatpush1.bf16.msra.mxu1 %v3415_v15 }
 0x139   :  { %2687 = vmatprep.subr.bf16.mxu0 %v3367_v58  ;;  %2719 = vmatprep.subr.bf16.mxu1 %v3421_v18 }
 0x13c   :  { %2689 = vmatpush1.bf16.msra.mxu0 %v3400_v7  ;;  %2721 = vmatpush1.bf16.msra.mxu1 %v3448_v31 }
 0x13d   :  { %2691 = vmatprep.subr.bf16.mxu0 %v3403_v10  ;;  %2723 = vmatprep.subr.bf16.mxu1 %v3451_v32 }
 0x140   :  { %2693 = vmatpush1.bf16.msra.mxu0 %v3436_v24  ;;  %2725 = vmatpush1.bf16.msra.mxu1 %v3470_v40 }
 0x141   :  { %2695 = vmatprep.subr.bf16.mxu0 %v3439_v27  ;;  %2727 = vmatprep.subr.bf16.mxu1 %v3473_v41  ;;  %v2463_v27 = vld [vmem:[%s4569_s0 + $0x30] sm:$0xff] }
 0x144   :  { %2697 = vmatpush1.bf16.msra.mxu0 %v3466_v39  ;;  %2729 = vmatpush1.bf16.msra.mxu1 %v3483_v47 }
 0x145   :  { %2763 = vmatprep.subr.bf16.mxu1 %v3260_v22  ;;  %v2464_v22 = vld [vmem:[%s4569_s0 + $0x38] sm:$0xff] }
 0x1fa   :  { %v450_v26 = vpop.f32.mrb[2].mxu0  ;;  %v521_v30 = vpop.f32.mrb[2].mxu1 }
 0x1fb   :  { %v526_v42 = vadd.f32 %v2461_v14, %v450_v26  ;;  %v452_v46 = vpop.f32.mrb[3].mxu0  ;;  %v523_v55 = vpop.f32.mrb[3].mxu1  ;;  %v528_v32 = vadd.f32 %v2463_v27, %v521_v30  ;;  %v959_v14 = vld [vmem:[%s4568_s1 + $0xe8] sm:$0xff]  ;;  %v954_v26 = vld [vmem:[%s4568_s1 + $0xc0] sm:$0xff] }
 0x1fc   :  { %v527_v58 = vadd.f32 %v2462_v17, %v452_v46  ;;  %v529_v24 = vadd.f32 %v2464_v22, %v523_v55  ;;  %v3723_v17 = vpack.c.bf16 %v959_v14, %v955_v5  ;;  %v958_v30 = vld [vmem:[%s4568_s1 + $0xe0] sm:$0xff]  ;;  %v963_v46 = vld [vmem:[%s4568_s1 + $0x108] sm:$0xff]  ;;  %v2475_v5 = vld [vmem:[%s4569_s0 + $0x58] sm:$0xff] }
 0x1fd   :  { %v2465_v7 = vmul.f32 -1.442695, %v526_v42  ;;  %v3731_v42 = vpack.c.bf16 %v958_v30, %v954_v26  ;;  %v967_v55 = vld [vmem:[%s4568_s1 + $0x128] sm:$0xff]  ;;  %v2474_v26 = vld [vmem:[%s4569_s0 + $0x50] sm:$0xff] }
 0x1fe   :  { %v2466_v10 = vmul.f32 -1.442695, %v527_v58  ;;  %v2467_v31 = vmul.f32 -1.442695, %v529_v24  ;;  %v3741_v58 = vpack.c.bf16 %v967_v55, %v963_v46  ;;  %v971_v24 = vld [vmem:[%s4568_s1 + $0x148] sm:$0xff] }
 0x1ff   :  { %3068 = vpow2.f32 %v2465_v7  ;;  %v962_v7 = vld [vmem:[%s4568_s1 + $0x100] sm:$0xff]  ;;  %v975_v27 = vld [vmem:[%s4568_s1 + $0x168] sm:$0xff] }
 0x200   :  { %3070 = vpow2.f32 %v2466_v10  ;;  %v966_v10 = vld [vmem:[%s4568_s1 + $0x120] sm:$0xff] }
 0x201   :  { %3072 = vpow2.f32 %v2467_v31  ;;  %v3749_v22 = vpack.c.bf16 %v966_v10, %v962_v7  ;;  %v970_v31 = vld [vmem:[%s4568_s1 + $0x140] sm:$0xff] }
 0x202   :  { %3074 = vtanh.f32 %v528_v32  ;;  %v3762_v32 = vpack.c.bf16 %v975_v27, %v971_v24 }
 0x209   :  { %v3069_v39 = vpop.eup %3068 }
 0x20a   :  { %v3071_v40 = vpop.eup %3070  ;;  %v533_v41 = vadd.f32 1.0, %v3069_v39  ;;  %v974_v39 = vld [vmem:[%s4568_s1 + $0x160] sm:$0xff] }
 0x20b   :  { %v539_v47 = vadd.f32 1.0, %v3071_v40  ;;  %v3073_v6 = vpop.eup %3072  ;;  %v972_v40 = vld [vmem:[%s4568_s1 + $0x150] sm:$0xff] }
 0x20c   :  { %3076 = vrcp.f32 %v533_v41  ;;  %v3075_v11 = vpop.eup %3074  ;;  %v546_v19 = vadd.f32 1.0, %v3073_v6  ;;  %v976_v41 = vld [vmem:[%s4568_s1 + $0x170] sm:$0xff] }
 0x20d   :  { %3078 = vrcp.f32 %v539_v47  ;;  %v3773_v47 = vpack.c.bf16 %v974_v39, %v970_v31  ;;  %v3775_v6 = vpack.c.bf16 %v976_v41, %v972_v40 }
 0x20e   :  { %3080 = vrcp.f32 %v546_v19  ;;  %v985_v19 = vld [vmem:[%s4568_s1 + $0x1b8] sm:$0xff] }
 0x216   :  { %v3077_v12 = vpop.eup %3076 }
 0x217   :  { %v3079_v13 = vpop.eup %3078  ;;  %v550_v16 = vmul.f32 %v3077_v12, %v3075_v11  ;;  %v979_v11 = vld [vmem:[%s4568_s1 + $0x188] sm:$0xff] }
 0x218   :  { %v549_v20 = vmul.f32 %v3079_v13, %v3537_v34  ;;  %v3081_v23 = vpop.eup %3080  ;;  %v983_v12 = vld [vmem:[%s4568_s1 + $0x1a8] sm:$0xff]  ;;  %v981_v13 = vld [vmem:[%s4568_s1 + $0x198] sm:$0xff] }
 0x21a   :  { %v3618_v21 = vadd.f32 %v550_v16, %v549_v20  ;;  %v3787_v16 = vpack.c.bf16 %v983_v12, %v979_v11  ;;  %v978_v20 = vld [vmem:[%s4568_s1 + $0x180] sm:$0xff] }
 0x21c   :  { %3082 = vtanh.f32 %v3618_v21 }
 0x226   :  { %v3083_v28 = vpop.eup %3082 }
 0x227   :  { %v553_v29 = vmul.f32 %v3083_v28, %v3081_v23  ;;  %v982_v23 = vld [vmem:[%s4568_s1 + $0x1a0] sm:$0xff]  ;;  %v3799_v28 = vpack.c.bf16 %v985_v19, %v981_v13 }
 0x229   :  { %v555_v35 = vcombine.high %v553_v29, %v553_v29  ;;  %v562_v36 = vrot.slane %v553_v29, %v3540_v50  ;;  %754 = vmatmul.mubr.f32.vlgmr.msra.gmra.mrb[4].mxu0 %v553_v29  ;;  %825 = vmatmul.mubr.f32.vlgmr.msra.gmra.mrb[4].mxu1 %v553_v29  ;;  %v980_v29 = vld [vmem:[%s4568_s1 + $0x190] sm:$0xff] }
 0x22a   :  { %2765 = vmatpush1.bf16.msra.mxu1 %v3268_v25  ;;  %1058 = vmatprep.mubr.f32.mxu0 %v3180_v3 }
 0x22b   :  { %v569_v38 = vrot.slane %v555_v35, %v3540_v50  ;;  %v570_v34 = vcombine.high %v562_v36, %v562_v36  ;;  %v578_v43 = vrot.slane %v562_v36, %v3540_v50  ;;  %2468 = vst.sshfl [vmem:[%s4570_s2 + $0x1] sm:$0x1 pattern:$0x73625140] %v562_v36  ;;  %2767 = vmatprep.subr.bf16.mxu1 %v3293_v33  ;;  %v984_v35 = vld [vmem:[%s4568_s1 + $0x1b0] sm:$0xff]  ;;  %v987_v36 = vld [vmem:[%s4568_s1 + $0x1c8] sm:$0xff] }
 0x22c   :  { %1129 = vmatprep.mubr.f32.mxu1 %v3180_v3 }
 0x22d   :  { %v571_v44 = vcombine.high %v569_v38, %v569_v38  ;;  %v585_v49 = vrot.slane %v569_v38, %v3540_v50  ;;  %v592_v25 = vrot.slane %v570_v34, %v3540_v50  ;;  %v600_v51 = vcombine.high %v578_v43, %v578_v43  ;;  %2469 = vst.sshfl [vmem:[%s4570_s2 + $0x9] sm:$0x1 pattern:$0x73625140] %v570_v34  ;;  %v991_v43 = vld [vmem:[%s4568_s1 + $0x1e8] sm:$0xff] }
 0x22e   :  { %2470 = vst.sshfl [vmem:[%s4570_s2 + $0x21] sm:$0x1 pattern:$0x73625140] %v569_v38  ;;  %2769 = vmatpush1.bf16.msra.mxu1 %v3304_v37  ;;  %v931_v37 = vld [vmem:[%s4568_s1 + $0x8] sm:$0xff]  ;;  %v3811_v38 = vpack.c.bf16 %v982_v23, %v978_v20  ;;  %v3813_v34 = vpack.c.bf16 %v984_v35, %v980_v29 }
 0x22f   :  { %v599_v33 = vrot.slane %v571_v44, %v3540_v50  ;;  %v601_v53 = vcombine.high %v585_v49, %v585_v49  ;;  %v602_v54 = vcombine.high %v592_v25, %v592_v25  ;;  %614 = vst [vmem:[%s4570_s2 + $0x11] sm:$0x1] %v600_v51  ;;  %2471 = vst.sshfl [vmem:[%s4570_s2 + $0x29] sm:$0x1 pattern:$0x73625140] %v571_v44  ;;  %2771 = vmatprep.subr.bf16.mxu1 %v3328_v45 }
 0x230   :  { %v935_v45 = vld [vmem:[%s4568_s1 + $0x28] sm:$0xff]  ;;  %v989_v44 = vld [vmem:[%s4568_s1 + $0x1d8] sm:$0xff]  ;;  %v3826_v25 = vpack.c.bf16 %v991_v43, %v987_v36 }
 0x231   :  { %v603_v56 = vcombine.high %v599_v33, %v599_v33  ;;  %615 = vst [vmem:[%s4570_s2 + $0x19] sm:$0x1] %v602_v54  ;;  %618 = vst [vmem:[%s4570_s2 + $0x31] sm:$0x1] %v601_v53  ;;  %v993_v49 = vld [vmem:[%s4568_s1 + $0x1f8] sm:$0xff]  ;;  %v986_v33 = vld [vmem:[%s4568_s1 + $0x1c0] sm:$0xff] }
 0x232   :  { %2773 = vmatpush1.bf16.msra.mxu1 %v3337_v48  ;;  %v3669_v48 = vpack.c.bf16 %v935_v45, %v931_v37  ;;  %v3828_v51 = vpack.c.bf16 %v993_v49, %v989_v44  ;;  %v990_v53 = vld [vmem:[%s4568_s1 + $0x1e0] sm:$0xff]  ;;  %v988_v54 = vld [vmem:[%s4568_s1 + $0x1d0] sm:$0xff] }
 0x233   :  { %619 = vst [vmem:[%s4570_s2 + $0x39] sm:$0x1] %v603_v56  ;;  %2775 = vmatprep.subr.bf16.mxu1 %v3349_v52  ;;  %v930_v52 = vld [vmem:[%s4568_s1] sm:$0xff]  ;;  %v992_v56 = vld [vmem:[%s4568_s1 + $0x1f0] sm:$0xff]  ;;  %v3847_v45 = vpack.c.bf16 %v990_v53, %v986_v33 }
 0x234   :  { %2731 = vmatprep.subr.bf16.mxu0 %v3669_v48  ;;  %v3843_v37 = vpack.c.bf16 %v992_v56, %v988_v54 }
 0x236   :  { %2777 = vmatpush1.bf16.msra.mxu1 %v3379_v62  ;;  %v934_v62 = vld [vmem:[%s4568_s1 + $0x20] sm:$0xff] }
 0x237   :  { %2779 = vmatprep.subr.bf16.mxu1 %v3385_v0  ;;  %v3677_v0 = vpack.c.bf16 %v934_v62, %v930_v52  ;;  %v2472_v52 = vld [vmem:[%s4569_s0 + $0x40] sm:$0xff]  ;;  %v2473_v62 = vld [vmem:[%s4569_s0 + $0x48] sm:$0xff] }
 0x239   :  { %2733 = vmatpush1.bf16.msra.mxu0 %v3677_v0 }
 0x23a   :  { %2781 = vmatpush1.bf16.msra.mxu1 %v3415_v15  ;;  %v939_v15 = vld [vmem:[%s4568_s1 + $0x48] sm:$0xff] }
 0x23b   :  { %2783 = vmatprep.subr.bf16.mxu1 %v3421_v18  ;;  %v943_v18 = vld [vmem:[%s4568_s1 + $0x68] sm:$0xff] }
 0x23c   :  { %v3687_v57 = vpack.c.bf16 %v943_v18, %v939_v15 }
 0x23e   :  { %2735 = vmatprep.subr.bf16.mxu0 %v3687_v57  ;;  %2785 = vmatpush1.bf16.msra.mxu1 %v3775_v6 }
 0x23f   :  { %2737 = vmatpush1.bf16.msra.mxu0 %v3695_v8  ;;  %2787 = vmatprep.subr.bf16.mxu1 %v3799_v28 }
 0x240   :  { %2739 = vmatprep.subr.bf16.mxu0 %v3705_v63 }
 0x242   :  { %2789 = vmatpush1.bf16.msra.mxu1 %v3813_v34 }
 0x243   :  { %2741 = vmatpush1.bf16.msra.mxu0 %v3713_v2  ;;  %2791 = vmatprep.subr.bf16.mxu1 %v3828_v51 }
 0x244   :  { %2743 = vmatprep.subr.bf16.mxu0 %v3723_v17 }
 0x246   :  { %2793 = vmatpush1.bf16.msra.mxu1 %v3843_v37 }
 0x247   :  { %2745 = vmatpush1.bf16.msra.mxu0 %v3731_v42 }
 0x248   :  { %2747 = vmatprep.subr.bf16.mxu0 %v3741_v58 }
 0x24b   :  { %2749 = vmatpush1.bf16.msra.mxu0 %v3749_v22 }
 0x24c   :  { %2751 = vmatprep.subr.bf16.mxu0 %v3762_v32 }
 0x24f   :  { %2753 = vmatpush1.bf16.msra.mxu0 %v3773_v47 }
 0x250   :  { %2755 = vmatprep.subr.bf16.mxu0 %v3787_v16 }
 0x253   :  { %2757 = vmatpush1.bf16.msra.mxu0 %v3811_v38 }
 0x254   :  { %2759 = vmatprep.subr.bf16.mxu0 %v3826_v25 }
 0x257   :  { %2761 = vmatpush1.bf16.msra.mxu0 %v3847_v45 }
 0x258   :  { %2795 = vmatprep.subr.bf16.mxu0 %v3669_v48 }
 0x2fc   :  { %v755_v15 = vpop.f32.mrb[4].mxu0  ;;  %v826_v18 = vpop.f32.mrb[4].mxu1 }
 0x2fd   :  { %v831_v4 = vadd.f32 %v2472_v52, %v755_v15  ;;  %v757_v59 = vpop.f32.mrb[5].mxu0  ;;  %v828_v60 = vpop.f32.mrb[5].mxu1  ;;  %v833_v46 = vadd.f32 %v2474_v26, %v826_v18  ;;  %v1238_v15 = vld [vmem:[%s4568_s1 + $0x18] sm:$0xff] }
 0x2fe   :  { %v832_v61 = vadd.f32 %v2473_v62, %v757_v59  ;;  %v834_v14 = vadd.f32 %v2475_v5, %v828_v60  ;;  %v1242_v18 = vld [vmem:[%s4568_s1 + $0x38] sm:$0xff]  ;;  %v1237_v59 = vld [vmem:[%s4568_s1 + $0x10] sm:$0xff] }
 0x2ff   :  { %v2476_v9 = vmul.f32 -1.442695, %v831_v4  ;;  %v3923_v4 = vpack.c.bf16 %v1242_v18, %v1238_v15  ;;  %v1241_v60 = vld [vmem:[%s4568_s1 + $0x30] sm:$0xff] }
 0x300   :  { %v2477_v1 = vmul.f32 -1.442695, %v832_v61  ;;  %v2478_v30 = vmul.f32 -1.442695, %v834_v14  ;;  %v3931_v61 = vpack.c.bf16 %v1241_v60, %v1237_v59  ;;  %v1245_v5 = vld [vmem:[%s4568_s1 + $0x50] sm:$0xff]  ;;  %v2486_v59 = vld [vmem:[%s4569_s0 + $0x78] sm:$0xff] }
 0x301   :  { %3084 = vpow2.f32 %v2476_v9  ;;  %2827 = vmatprep.subr.bf16.mxu1 %v3923_v4  ;;  %v1250_v9 = vld [vmem:[%s4568_s1 + $0x78] sm:$0xff]  ;;  %v1249_v14 = vld [vmem:[%s4568_s1 + $0x70] sm:$0xff] }
 0x302   :  { %3086 = vpow2.f32 %v2477_v1  ;;  %v3949_v26 = vpack.c.bf16 %v1249_v14, %v1245_v5 }
 0x303   :  { %3088 = vpow2.f32 %v2478_v30  ;;  %v1254_v30 = vld [vmem:[%s4568_s1 + $0x98] sm:$0xff] }
 0x304   :  { %3090 = vtanh.f32 %v833_v46  ;;  %v1258_v46 = vld [vmem:[%s4568_s1 + $0xb8] sm:$0xff] }
 0x30b   :  { %v3085_v55 = vpop.eup %3084 }
 0x30c   :  { %v3087_v7 = vpop.eup %3086  ;;  %v838_v10 = vadd.f32 1.0, %v3085_v55  ;;  %v3959_v55 = vpack.c.bf16 %v1258_v46, %v1254_v30 }
 0x30d   :  { %v844_v24 = vadd.f32 1.0, %v3087_v7  ;;  %v3089_v27 = vpop.eup %3088  ;;  %v1253_v7 = vld [vmem:[%s4568_s1 + $0x90] sm:$0xff] }
 0x30e   :  { %3092 = vrcp.f32 %v838_v10  ;;  %v3091_v31 = vpop.eup %3090  ;;  %v851_v11 = vadd.f32 1.0, %v3089_v27  ;;  %v1257_v10 = vld [vmem:[%s4568_s1 + $0xb0] sm:$0xff]  ;;  %v1262_v27 = vld [vmem:[%s4568_s1 + $0xd8] sm:$0xff] }
 0x30f   :  { %3094 = vrcp.f32 %v844_v24  ;;  %v3967_v24 = vpack.c.bf16 %v1257_v10, %v1253_v7 }
 0x310   :  { %3096 = vrcp.f32 %v851_v11 }
 0x318   :  { %v3093_v39 = vpop.eup %3092 }
 0x319   :  { %v3095_v40 = vpop.eup %3094  ;;  %v855_v41 = vmul.f32 %v3093_v39, %v3091_v31  ;;  %v1266_v31 = vld [vmem:[%s4568_s1 + $0xf8] sm:$0xff] }
 0x31a   :  { %v854_v12 = vmul.f32 %v3095_v40, %v3618_v21  ;;  %v3097_v19 = vpop.eup %3096  ;;  %v3977_v39 = vpack.c.bf16 %v1266_v31, %v1262_v27  ;;  %v1261_v40 = vld [vmem:[%s4568_s1 + $0xd0] sm:$0xff] }
 0x31c   :  { %v3866_v13 = vadd.f32 %v855_v41, %v854_v12  ;;  %v1265_v41 = vld [vmem:[%s4568_s1 + $0xf0] sm:$0xff]  ;;  %v1270_v12 = vld [vmem:[%s4568_s1 + $0x118] sm:$0xff] }
 0x31d   :  { %v3985_v11 = vpack.c.bf16 %v1265_v41, %v1261_v40 }
 0x31e   :  { %3098 = vtanh.f32 %v3866_v13 }
 0x328   :  { %v3099_v20 = vpop.eup %3098 }
 0x329   :  { %v858_v23 = vmul.f32 %v3099_v20, %v3097_v19  ;;  %v1274_v19 = vld [vmem:[%s4568_s1 + $0x138] sm:$0xff] }
 0x32a   :  { %v3995_v20 = vpack.c.bf16 %v1274_v19, %v1270_v12 }
 0x32b   :  { %v860_v29 = vcombine.high %v858_v23, %v858_v23  ;;  %v867_v35 = vrot.slane %v858_v23, %v3540_v50  ;;  %1059 = vmatmul.mubr.f32.vlgmr.msra.gmra.mrb[6].mxu0 %v858_v23  ;;  %1130 = vmatmul.mubr.f32.vlgmr.msra.gmra.mrb[6].mxu1 %v858_v23  ;;  %v1269_v23 = vld [vmem:[%s4568_s1 + $0x110] sm:$0xff] }
 0x32c   :  { %2797 = vmatpush1.bf16.msra.mxu0 %v3677_v0  ;;  %1363 = vmatprep.mubr.f32.mxu0 %v3180_v3 }
 0x32d   :  { %v874_v36 = vrot.slane %v860_v29, %v3540_v50  ;;  %v875_v21 = vcombine.high %v867_v35, %v867_v35  ;;  %v883_v43 = vrot.slane %v867_v35, %v3540_v50  ;;  %2479 = vst.sshfl [vmem:[%s4570_s2 + $0x2] sm:$0x1 pattern:$0x73625140] %v867_v35  ;;  %2799 = vmatprep.subr.bf16.mxu0 %v3687_v57  ;;  %v1273_v29 = vld [vmem:[%s4568_s1 + $0x130] sm:$0xff] }
 0x32e   :  { %1434 = vmatprep.mubr.f32.mxu1 %v3180_v3  ;;  %2829 = vmatpush1.bf16.msra.mxu1 %v3931_v61  ;;  %v4003_v35 = vpack.c.bf16 %v1273_v29, %v1269_v23 }
 0x32f   :  { %v876_v44 = vcombine.high %v874_v36, %v874_v36  ;;  %v890_v49 = vrot.slane %v874_v36, %v3540_v50  ;;  %v897_v33 = vrot.slane %v875_v21, %v3540_v50  ;;  %v905_v53 = vcombine.high %v883_v43, %v883_v43  ;;  %2480 = vst.sshfl [vmem:[%s4570_s2 + $0xa] sm:$0x1 pattern:$0x73625140] %v875_v21  ;;  %v1282_v21 = vld [vmem:[%s4568_s1 + $0x178] sm:$0xff] }
 0x330   :  { %2481 = vst.sshfl [vmem:[%s4570_s2 + $0x22] sm:$0x1 pattern:$0x73625140] %v874_v36  ;;  %2801 = vmatpush1.bf16.msra.mxu0 %v3695_v8  ;;  %v1278_v36 = vld [vmem:[%s4568_s1 + $0x158] sm:$0xff] }
 0x331   :  { %v904_v54 = vrot.slane %v876_v44, %v3540_v50  ;;  %v906_v56 = vcombine.high %v890_v49, %v890_v49  ;;  %v907_v52 = vcombine.high %v897_v33, %v897_v33  ;;  %919 = vst [vmem:[%s4570_s2 + $0x12] sm:$0x1] %v905_v53  ;;  %2482 = vst.sshfl [vmem:[%s4570_s2 + $0x2a] sm:$0x1 pattern:$0x73625140] %v876_v44  ;;  %2803 = vmatprep.subr.bf16.mxu0 %v3705_v63 }
 0x332   :  { %v4013_v43 = vpack.c.bf16 %v1282_v21, %v1278_v36  ;;  %v2483_v44 = vld [vmem:[%s4569_s0 + $0x60] sm:$0xff]  ;;  %v2484_v49 = vld [vmem:[%s4569_s0 + $0x68] sm:$0xff] }
 0x333   :  { %v908_v62 = vcombine.high %v904_v54, %v904_v54  ;;  %920 = vst [vmem:[%s4570_s2 + $0x1a] sm:$0x1] %v907_v52  ;;  %923 = vst [vmem:[%s4570_s2 + $0x32] sm:$0x1] %v906_v56 }
 0x334   :  { %2805 = vmatpush1.bf16.msra.mxu0 %v3713_v2 }
 0x335   :  { %924 = vst [vmem:[%s4570_s2 + $0x3a] sm:$0x1] %v908_v62  ;;  %2807 = vmatprep.subr.bf16.mxu0 %v3723_v17 }
 0x338   :  { %2809 = vmatpush1.bf16.msra.mxu0 %v3731_v42 }
 0x339   :  { %2811 = vmatprep.subr.bf16.mxu0 %v3741_v58 }
 0x33c   :  { %2813 = vmatpush1.bf16.msra.mxu0 %v3749_v22 }
 0x33d   :  { %2815 = vmatprep.subr.bf16.mxu0 %v3762_v32 }
 0x340   :  { %2817 = vmatpush1.bf16.msra.mxu0 %v3773_v47 }
 0x341   :  { %2819 = vmatprep.subr.bf16.mxu0 %v3787_v16 }
 0x344   :  { %2821 = vmatpush1.bf16.msra.mxu0 %v3811_v38 }
 0x345   :  { %2823 = vmatprep.subr.bf16.mxu0 %v3826_v25 }
 0x348   :  { %2825 = vmatpush1.bf16.msra.mxu0 %v3847_v45 }
 0x349   :  { %2859 = vmatprep.subr.bf16.mxu0 %v3669_v48  ;;  %v1246_v48 = vld [vmem:[%s4568_s1 + $0x58] sm:$0xff] }
 0x34a   :  { %v3941_v1 = vpack.c.bf16 %v1250_v9, %v1246_v48  ;;  %v2485_v48 = vld [vmem:[%s4569_s0 + $0x70] sm:$0xff] }
 0x34c   :  { %2831 = vmatprep.subr.bf16.mxu1 %v3941_v1 }
 0x34d   :  { %2833 = vmatpush1.bf16.msra.mxu1 %v3949_v26 }
 0x34e   :  { %2835 = vmatprep.subr.bf16.mxu1 %v3959_v55 }
 0x351   :  { %2837 = vmatpush1.bf16.msra.mxu1 %v3967_v24 }
 0x352   :  { %2839 = vmatprep.subr.bf16.mxu1 %v3977_v39 }
 0x355   :  { %2841 = vmatpush1.bf16.msra.mxu1 %v3985_v11 }
 0x356   :  { %2843 = vmatprep.subr.bf16.mxu1 %v3995_v20 }
 0x359   :  { %2845 = vmatpush1.bf16.msra.mxu1 %v4003_v35 }
 0x35a   :  { %2847 = vmatprep.subr.bf16.mxu1 %v4013_v43 }
 0x35d   :  { %2849 = vmatpush1.bf16.msra.mxu1 %v3775_v6 }
 0x35e   :  { %2851 = vmatprep.subr.bf16.mxu1 %v3799_v28 }
 0x361   :  { %2853 = vmatpush1.bf16.msra.mxu1 %v3813_v34 }
 0x362   :  { %2855 = vmatprep.subr.bf16.mxu1 %v3828_v51 }
 0x365   :  { %2857 = vmatpush1.bf16.msra.mxu1 %v3843_v37 }
 0x366   :  { %2891 = vmatprep.subr.bf16.mxu1 %v3923_v4 }
 0x3fe   :  { %v1060_v33 = vpop.f32.mrb[6].mxu0  ;;  %v1131_v53 = vpop.f32.mrb[6].mxu1 }
 0x3ff   :  { %v1136_v54 = vadd.f32 %v2483_v44, %v1060_v33  ;;  %v1062_v56 = vpop.f32.mrb[7].mxu0  ;;  %v1133_v52 = vpop.f32.mrb[7].mxu1  ;;  %v1138_v5 = vadd.f32 %v2485_v48, %v1131_v53 }
 0x400   :  { %v1137_v62 = vadd.f32 %v2484_v49, %v1062_v56  ;;  %v1139_v60 = vadd.f32 %v2486_v59, %v1133_v52 }
 0x401   :  { %v2487_v15 = vmul.f32 -1.442695, %v1136_v54 }
 0x402   :  { %v2488_v18 = vmul.f32 -1.442695, %v1137_v62  ;;  %v2489_v9 = vmul.f32 -1.442695, %v1139_v60 }
 0x403   :  { %3100 = vpow2.f32 %v2487_v15 }
 0x404   :  { %3102 = vpow2.f32 %v2488_v18 }
 0x405   :  { %3104 = vpow2.f32 %v2489_v9 }
 0x406   :  { %3106 = vtanh.f32 %v1138_v5 }
 0x40d   :  { %v3101_v14 = vpop.eup %3100 }
 0x40e   :  { %v3103_v30 = vpop.eup %3102  ;;  %v1143_v46 = vadd.f32 1.0, %v3101_v14 }
 0x40f   :  { %v1149_v7 = vadd.f32 1.0, %v3103_v30  ;;  %v3105_v10 = vpop.eup %3104 }
 0x410   :  { %3108 = vrcp.f32 %v1143_v46  ;;  %v3107_v27 = vpop.eup %3106  ;;  %v1156_v12 = vadd.f32 1.0, %v3105_v10 }
 0x411   :  { %3110 = vrcp.f32 %v1149_v7 }
 0x412   :  { %3112 = vrcp.f32 %v1156_v12 }
 0x41a   :  { %v3109_v31 = vpop.eup %3108 }
 0x41b   :  { %v3111_v40 = vpop.eup %3110  ;;  %v1160_v41 = vmul.f32 %v3109_v31, %v3107_v27 }
 0x41c   :  { %v1159_v19 = vmul.f32 %v3111_v40, %v3866_v13  ;;  %v3113_v29 = vpop.eup %3112 }
 0x41e   :  { %v4035_v23 = vadd.f32 %v1160_v41, %v1159_v19 }
 0x420   :  { %3114 = vtanh.f32 %v4035_v23 }
 0x42a   :  { %v3115_v36 = vpop.eup %3114 }
 0x42b   :  { %v1163_v21 = vmul.f32 %v3115_v36, %v3113_v29 }
 0x42d   :  { %v1165_v44 = vcombine.high %v1163_v21, %v1163_v21  ;;  %v1172_v49 = vrot.slane %v1163_v21, %v3540_v50  ;;  %1364 = vmatmul.mubr.f32.vlgmr.msra.gmra.mrb[8].mxu0 %v1163_v21  ;;  %1435 = vmatmul.mubr.f32.vlgmr.msra.gmra.mrb[8].mxu1 %v1163_v21 }
 0x42e   :  { %2861 = vmatpush1.bf16.msra.mxu0 %v3677_v0  ;;  %2893 = vmatpush1.bf16.msra.mxu1 %v3931_v61 }
 0x42f   :  { %v1179_v33 = vrot.slane %v1165_v44, %v3540_v50  ;;  %v1180_v13 = vcombine.high %v1172_v49, %v1172_v49  ;;  %v1188_v53 = vrot.slane %v1172_v49, %v3540_v50  ;;  %2490 = vst.sshfl [vmem:[%s4570_s2 + $0x3] sm:$0x1 pattern:$0x73625140] %v1172_v49  ;;  %2863 = vmatprep.subr.bf16.mxu0 %v3687_v57 }
 0x430   :  { %2895 = vmatprep.subr.bf16.mxu1 %v3941_v1  ;;  %1668 = vmatprep.mubr.f32.mxu0 %v3180_v3 }
 0x431   :  { %1739 = vmatprep.mubr.f32.mxu1 %v3180_v3  ;;  %v1181_v0 = vcombine.high %v1179_v33, %v1179_v33  ;;  %v1195_v54 = vrot.slane %v1179_v33, %v3540_v50  ;;  %v1202_v56 = vrot.slane %v1180_v13, %v3540_v50  ;;  %v1210_v52 = vcombine.high %v1188_v53, %v1188_v53  ;;  %v1857_v53 = vld [vmem:[%s4568_s1 + $0x60] sm:$0xff] }
 0x432   :  { %2491 = vst.sshfl [vmem:[%s4570_s2 + $0xb] sm:$0x1 pattern:$0x73625140] %v1180_v13  ;;  %2865 = vmatpush1.bf16.msra.mxu0 %v3695_v8  ;;  %2897 = vmatpush1.bf16.msra.mxu1 %v3949_v26  ;;  %v2494_v8 = vld [vmem:[%s4569_s0 + $0x80] sm:$0xff] }
 0x433   :  { %2492 = vst.sshfl [vmem:[%s4570_s2 + $0x23] sm:$0x1 pattern:$0x73625140] %v1179_v33  ;;  %v1209_v57 = vrot.slane %v1181_v0, %v3540_v50  ;;  %v1211_v62 = vcombine.high %v1195_v54, %v1195_v54  ;;  %v1212_v15 = vcombine.high %v1202_v56, %v1202_v56  ;;  %1224 = vst [vmem:[%s4570_s2 + $0x13] sm:$0x1] %v1210_v52  ;;  %2867 = vmatprep.subr.bf16.mxu0 %v3705_v63 }
 0x434   :  { %2493 = vst.sshfl [vmem:[%s4570_s2 + $0x2b] sm:$0x1 pattern:$0x73625140] %v1181_v0  ;;  %2899 = vmatprep.subr.bf16.mxu1 %v3959_v55  ;;  %v2495_v63 = vld [vmem:[%s4569_s0 + $0x88] sm:$0xff]  ;;  %v1853_v13 = vld [vmem:[%s4568_s1 + $0x40] sm:$0xff] }
 0x435   :  { %v1213_v18 = vcombine.high %v1209_v57, %v1209_v57  ;;  %1225 = vst [vmem:[%s4570_s2 + $0x1b] sm:$0x1] %v1212_v15  ;;  %1228 = vst [vmem:[%s4570_s2 + $0x33] sm:$0x1] %v1211_v62  ;;  %v4191_v0 = vpack.c.bf16 %v1857_v53, %v1853_v13  ;;  %v1862_v54 = vld [vmem:[%s4568_s1 + $0x88] sm:$0xff]  ;;  %v1861_v57 = vld [vmem:[%s4568_s1 + $0x80] sm:$0xff] }
 0x436   :  { %2869 = vmatpush1.bf16.msra.mxu0 %v3713_v2  ;;  %2901 = vmatpush1.bf16.msra.mxu1 %v3967_v24  ;;  %v1866_v56 = vld [vmem:[%s4568_s1 + $0xa8] sm:$0xff]  ;;  %v1865_v62 = vld [vmem:[%s4568_s1 + $0xa0] sm:$0xff] }
 0x437   :  { %1229 = vst [vmem:[%s4570_s2 + $0x3b] sm:$0x1] %v1213_v18  ;;  %2871 = vmatprep.subr.bf16.mxu0 %v3723_v17  ;;  %2903 = vmatprep.subr.bf16.mxu1 %v3977_v39  ;;  %v4201_v52 = vpack.c.bf16 %v1866_v56, %v1862_v54  ;;  %v4209_v15 = vpack.c.bf16 %v1865_v62, %v1861_v57  ;;  %v1870_v18 = vld [vmem:[%s4568_s1 + $0xc8] sm:$0xff] }
 0x43a   :  { %2873 = vmatpush1.bf16.msra.mxu0 %v3731_v42  ;;  %2905 = vmatpush1.bf16.msra.mxu1 %v3985_v11 }
 0x43b   :  { %2875 = vmatprep.subr.bf16.mxu0 %v3741_v58  ;;  %2907 = vmatprep.subr.bf16.mxu1 %v3995_v20 }
 0x43e   :  { %2877 = vmatpush1.bf16.msra.mxu0 %v3749_v22  ;;  %2909 = vmatpush1.bf16.msra.mxu1 %v4003_v35 }
 0x43f   :  { %2879 = vmatprep.subr.bf16.mxu0 %v3762_v32  ;;  %2911 = vmatprep.subr.bf16.mxu1 %v4013_v43 }
 0x442   :  { %2881 = vmatpush1.bf16.msra.mxu0 %v3773_v47  ;;  %2913 = vmatpush1.bf16.msra.mxu1 %v3775_v6 }
 0x443   :  { %2883 = vmatprep.subr.bf16.mxu0 %v3787_v16  ;;  %2915 = vmatprep.subr.bf16.mxu1 %v3799_v28  ;;  %v2497_v16 = vld [vmem:[%s4569_s0 + $0x98] sm:$0xff] }
 0x446   :  { %2885 = vmatpush1.bf16.msra.mxu0 %v3811_v38  ;;  %2917 = vmatpush1.bf16.msra.mxu1 %v3813_v34  ;;  %v2496_v38 = vld [vmem:[%s4569_s0 + $0x90] sm:$0xff] }
 0x447   :  { %2887 = vmatprep.subr.bf16.mxu0 %v3826_v25  ;;  %2919 = vmatprep.subr.bf16.mxu1 %v3828_v51 }
 0x44a   :  { %2889 = vmatpush1.bf16.msra.mxu0 %v3847_v45  ;;  %2921 = vmatpush1.bf16.msra.mxu1 %v3843_v37 }
 0x44b   :  { %2955 = vmatprep.subr.bf16.mxu1 %v3923_v4 }
 0x500   :  { %v1365_v2 = vpop.f32.mrb[8].mxu0  ;;  %v1436_v17 = vpop.f32.mrb[8].mxu1 }
 0x501   :  { %v1441_v42 = vadd.f32 %v2494_v8, %v1365_v2  ;;  %v1367_v58 = vpop.f32.mrb[9].mxu0  ;;  %v1438_v22 = vpop.f32.mrb[9].mxu1  ;;  %v1443_v25 = vadd.f32 %v2496_v38, %v1436_v17  ;;  %v1874_v8 = vld [vmem:[%s4568_s1 + $0xe8] sm:$0xff]  ;;  %v1869_v2 = vld [vmem:[%s4568_s1 + $0xc0] sm:$0xff] }
 0x502   :  { %v1442_v32 = vadd.f32 %v2495_v63, %v1367_v58  ;;  %v1444_v28 = vadd.f32 %v2497_v16, %v1438_v22  ;;  %v4219_v63 = vpack.c.bf16 %v1874_v8, %v1870_v18  ;;  %v1873_v17 = vld [vmem:[%s4568_s1 + $0xe0] sm:$0xff]  ;;  %v1878_v58 = vld [vmem:[%s4568_s1 + $0x108] sm:$0xff]  ;;  %v2507_v8 = vld [vmem:[%s4569_s0 + $0xb0] sm:$0xff] }
 0x503   :  { %v2498_v47 = vmul.f32 -1.442695, %v1441_v42  ;;  %v4227_v42 = vpack.c.bf16 %v1873_v17, %v1869_v2  ;;  %v1882_v22 = vld [vmem:[%s4568_s1 + $0x128] sm:$0xff] }
 0x504   :  { %v2499_v6 = vmul.f32 -1.442695, %v1442_v32  ;;  %v2500_v34 = vmul.f32 -1.442695, %v1444_v28  ;;  %v4237_v32 = vpack.c.bf16 %v1882_v22, %v1878_v58  ;;  %v1886_v28 = vld [vmem:[%s4568_s1 + $0x148] sm:$0xff] }
 0x505   :  { %3116 = vpow2.f32 %v2498_v47  ;;  %v1877_v47 = vld [vmem:[%s4568_s1 + $0x100] sm:$0xff]  ;;  %v1890_v38 = vld [vmem:[%s4568_s1 + $0x168] sm:$0xff] }
 0x506   :  { %3118 = vpow2.f32 %v2499_v6  ;;  %v1881_v6 = vld [vmem:[%s4568_s1 + $0x120] sm:$0xff] }
 0x507   :  { %3120 = vpow2.f32 %v2500_v34  ;;  %v4245_v16 = vpack.c.bf16 %v1881_v6, %v1877_v47  ;;  %v1885_v34 = vld [vmem:[%s4568_s1 + $0x140] sm:$0xff] }
 0x508   :  { %3122 = vtanh.f32 %v1443_v25  ;;  %v4258_v25 = vpack.c.bf16 %v1890_v38, %v1886_v28 }
 0x50f   :  { %v3117_v51 = vpop.eup %3116 }
 0x510   :  { %v3119_v37 = vpop.eup %3118  ;;  %v1448_v45 = vadd.f32 1.0, %v3117_v51  ;;  %v1889_v51 = vld [vmem:[%s4568_s1 + $0x160] sm:$0xff] }
 0x511   :  { %v1454_v4 = vadd.f32 1.0, %v3119_v37  ;;  %v3121_v59 = vpop.eup %3120  ;;  %v1887_v37 = vld [vmem:[%s4568_s1 + $0x150] sm:$0xff] }
 0x512   :  { %3124 = vrcp.f32 %v1448_v45  ;;  %v3123_v60 = vpop.eup %3122  ;;  %v1461_v14 = vadd.f32 1.0, %v3121_v59  ;;  %v1891_v45 = vld [vmem:[%s4568_s1 + $0x170] sm:$0xff] }
 0x513   :  { %3126 = vrcp.f32 %v1454_v4  ;;  %v4269_v4 = vpack.c.bf16 %v1889_v51, %v1885_v34  ;;  %v4271_v59 = vpack.c.bf16 %v1891_v45, %v1887_v37 }
 0x514   :  { %3128 = vrcp.f32 %v1461_v14  ;;  %v1900_v14 = vld [vmem:[%s4568_s1 + $0x1b8] sm:$0xff] }
 0x51c   :  { %v3125_v48 = vpop.eup %3124 }
 0x51d   :  { %v3127_v9 = vpop.eup %3126  ;;  %v1465_v5 = vmul.f32 %v3125_v48, %v3123_v60  ;;  %v1894_v60 = vld [vmem:[%s4568_s1 + $0x188] sm:$0xff] }
 0x51e   :  { %v1464_v30 = vmul.f32 %v3127_v9, %v4035_v23  ;;  %v3129_v7 = vpop.eup %3128  ;;  %v1898_v48 = vld [vmem:[%s4568_s1 + $0x1a8] sm:$0xff]  ;;  %v1896_v9 = vld [vmem:[%s4568_s1 + $0x198] sm:$0xff] }
 0x520   :  { %v4114_v46 = vadd.f32 %v1465_v5, %v1464_v30  ;;  %v4283_v5 = vpack.c.bf16 %v1898_v48, %v1894_v60  ;;  %v1893_v30 = vld [vmem:[%s4568_s1 + $0x180] sm:$0xff] }
 0x522   :  { %3130 = vtanh.f32 %v4114_v46 }
 0x52c   :  { %v3131_v10 = vpop.eup %3130 }
 0x52d   :  { %v1468_v27 = vmul.f32 %v3131_v10, %v3129_v7  ;;  %v1897_v7 = vld [vmem:[%s4568_s1 + $0x1a0] sm:$0xff]  ;;  %v4295_v10 = vpack.c.bf16 %v1900_v14, %v1896_v9 }
 0x52f   :  { %v1470_v31 = vcombine.high %v1468_v27, %v1468_v27  ;;  %v1477_v40 = vrot.slane %v1468_v27, %v3540_v50  ;;  %1669 = vmatmul.mubr.f32.vlgmr.msra.gmra.mrb[10].mxu0 %v1468_v27  ;;  %1740 = vmatmul.mubr.f32.vlgmr.msra.gmra.mrb[10].mxu1 %v1468_v27  ;;  %v1895_v27 = vld [vmem:[%s4568_s1 + $0x190] sm:$0xff] }
 0x530   :  { %2957 = vmatpush1.bf16.msra.mxu1 %v3931_v61  ;;  %1973 = vmatprep.mubr.f32.mxu0 %v3180_v3 }
 0x531   :  { %v1484_v41 = vrot.slane %v1470_v31, %v3540_v50  ;;  %v1485_v12 = vcombine.high %v1477_v40, %v1477_v40  ;;  %v1493_v19 = vrot.slane %v1477_v40, %v3540_v50  ;;  %2501 = vst.sshfl [vmem:[%s4570_s2 + $0x4] sm:$0x1 pattern:$0x73625140] %v1477_v40  ;;  %2959 = vmatprep.subr.bf16.mxu1 %v3941_v1  ;;  %v1899_v31 = vld [vmem:[%s4568_s1 + $0x1b0] sm:$0xff]  ;;  %v1902_v40 = vld [vmem:[%s4568_s1 + $0x1c8] sm:$0xff] }
 0x532   :  { %2044 = vmatprep.mubr.f32.mxu1 %v3180_v3 }
 0x533   :  { %v1486_v23 = vcombine.high %v1484_v41, %v1484_v41  ;;  %v1500_v29 = vrot.slane %v1484_v41, %v3540_v50  ;;  %v1507_v61 = vrot.slane %v1485_v12, %v3540_v50  ;;  %v1515_v36 = vcombine.high %v1493_v19, %v1493_v19  ;;  %2502 = vst.sshfl [vmem:[%s4570_s2 + $0xc] sm:$0x1 pattern:$0x73625140] %v1485_v12  ;;  %v1906_v19 = vld [vmem:[%s4568_s1 + $0x1e8] sm:$0xff] }
 0x534   :  { %2503 = vst.sshfl [vmem:[%s4570_s2 + $0x24] sm:$0x1 pattern:$0x73625140] %v1484_v41  ;;  %2961 = vmatpush1.bf16.msra.mxu1 %v3949_v26  ;;  %v1846_v26 = vld [vmem:[%s4568_s1 + $0x8] sm:$0xff]  ;;  %v4307_v41 = vpack.c.bf16 %v1897_v7, %v1893_v30  ;;  %v4309_v12 = vpack.c.bf16 %v1899_v31, %v1895_v27 }
 0x535   :  { %v1514_v1 = vrot.slane %v1486_v23, %v3540_v50  ;;  %v1516_v21 = vcombine.high %v1500_v29, %v1500_v29  ;;  %v1517_v44 = vcombine.high %v1507_v61, %v1507_v61  ;;  %1529 = vst [vmem:[%s4570_s2 + $0x14] sm:$0x1] %v1515_v36  ;;  %2504 = vst.sshfl [vmem:[%s4570_s2 + $0x2c] sm:$0x1 pattern:$0x73625140] %v1486_v23  ;;  %2963 = vmatprep.subr.bf16.mxu1 %v3959_v55 }
 0x536   :  { %v1850_v55 = vld [vmem:[%s4568_s1 + $0x28] sm:$0xff]  ;;  %v1904_v23 = vld [vmem:[%s4568_s1 + $0x1d8] sm:$0xff]  ;;  %v4322_v61 = vpack.c.bf16 %v1906_v19, %v1902_v40 }
 0x537   :  { %v1518_v49 = vcombine.high %v1514_v1, %v1514_v1  ;;  %1530 = vst [vmem:[%s4570_s2 + $0x1c] sm:$0x1] %v1517_v44  ;;  %1533 = vst [vmem:[%s4570_s2 + $0x34] sm:$0x1] %v1516_v21  ;;  %v1908_v29 = vld [vmem:[%s4568_s1 + $0x1f8] sm:$0xff]  ;;  %v1901_v1 = vld [vmem:[%s4568_s1 + $0x1c0] sm:$0xff] }
 0x538   :  { %2965 = vmatpush1.bf16.msra.mxu1 %v3967_v24  ;;  %v4165_v24 = vpack.c.bf16 %v1850_v55, %v1846_v26  ;;  %v4324_v36 = vpack.c.bf16 %v1908_v29, %v1904_v23  ;;  %v1905_v21 = vld [vmem:[%s4568_s1 + $0x1e0] sm:$0xff]  ;;  %v1903_v44 = vld [vmem:[%s4568_s1 + $0x1d0] sm:$0xff] }
 0x539   :  { %1534 = vst [vmem:[%s4570_s2 + $0x3c] sm:$0x1] %v1518_v49  ;;  %2967 = vmatprep.subr.bf16.mxu1 %v3977_v39  ;;  %v1845_v39 = vld [vmem:[%s4568_s1] sm:$0xff]  ;;  %v1907_v49 = vld [vmem:[%s4568_s1 + $0x1f0] sm:$0xff]  ;;  %v4343_v55 = vpack.c.bf16 %v1905_v21, %v1901_v1 }
 0x53a   :  { %2923 = vmatprep.subr.bf16.mxu0 %v4165_v24  ;;  %v4339_v26 = vpack.c.bf16 %v1907_v49, %v1903_v44  ;;  %v2169_v44 = vld [vmem:[%s4568_s1 + $0x98] sm:$0xff] }
 0x53b   :  { %v2173_v49 = vld [vmem:[%s4568_s1 + $0xb8] sm:$0xff] }
 0x53c   :  { %2969 = vmatpush1.bf16.msra.mxu1 %v3985_v11  ;;  %v1849_v11 = vld [vmem:[%s4568_s1 + $0x20] sm:$0xff] }
 0x53d   :  { %2971 = vmatprep.subr.bf16.mxu1 %v3995_v20  ;;  %v4173_v20 = vpack.c.bf16 %v1849_v11, %v1845_v39  ;;  %v2505_v39 = vld [vmem:[%s4569_s0 + $0xa0] sm:$0xff]  ;;  %v2506_v11 = vld [vmem:[%s4569_s0 + $0xa8] sm:$0xff] }
 0x53f   :  { %2925 = vmatpush1.bf16.msra.mxu0 %v4173_v20 }
 0x540   :  { %2973 = vmatpush1.bf16.msra.mxu1 %v4003_v35  ;;  %v1854_v35 = vld [vmem:[%s4568_s1 + $0x48] sm:$0xff] }
 0x541   :  { %2975 = vmatprep.subr.bf16.mxu1 %v4013_v43  ;;  %v1858_v43 = vld [vmem:[%s4568_s1 + $0x68] sm:$0xff] }
 0x542   :  { %v4183_v33 = vpack.c.bf16 %v1858_v43, %v1854_v35 }
 0x544   :  { %2927 = vmatprep.subr.bf16.mxu0 %v4183_v33  ;;  %2977 = vmatpush1.bf16.msra.mxu1 %v4271_v59 }
 0x545   :  { %2929 = vmatpush1.bf16.msra.mxu0 %v4191_v0  ;;  %2979 = vmatprep.subr.bf16.mxu1 %v4295_v10 }
 0x546   :  { %2931 = vmatprep.subr.bf16.mxu0 %v4201_v52 }
 0x548   :  { %2981 = vmatpush1.bf16.msra.mxu1 %v4309_v12 }
 0x549   :  { %2933 = vmatpush1.bf16.msra.mxu0 %v4209_v15  ;;  %2983 = vmatprep.subr.bf16.mxu1 %v4324_v36 }
 0x54a   :  { %2935 = vmatprep.subr.bf16.mxu0 %v4219_v63 }
 0x54c   :  { %2985 = vmatpush1.bf16.msra.mxu1 %v4339_v26 }
 0x54d   :  { %2937 = vmatpush1.bf16.msra.mxu0 %v4227_v42 }
 0x54e   :  { %2939 = vmatprep.subr.bf16.mxu0 %v4237_v32 }
 0x551   :  { %2941 = vmatpush1.bf16.msra.mxu0 %v4245_v16 }
 0x552   :  { %2943 = vmatprep.subr.bf16.mxu0 %v4258_v25 }
 0x555   :  { %2945 = vmatpush1.bf16.msra.mxu0 %v4269_v4 }
 0x556   :  { %2947 = vmatprep.subr.bf16.mxu0 %v4283_v5 }
 0x559   :  { %2949 = vmatpush1.bf16.msra.mxu0 %v4307_v41 }
 0x55a   :  { %2951 = vmatprep.subr.bf16.mxu0 %v4322_v61 }
 0x55d   :  { %2953 = vmatpush1.bf16.msra.mxu0 %v4343_v55 }
 0x55e   :  { %2987 = vmatprep.subr.bf16.mxu0 %v4165_v24  ;;  %v2508_v24 = vld [vmem:[%s4569_s0 + $0xb8] sm:$0xff] }
 0x602   :  { %v1670_v35 = vpop.f32.mrb[10].mxu0  ;;  %v1741_v43 = vpop.f32.mrb[10].mxu1 }
 0x603   :  { %v1746_v13 = vadd.f32 %v2505_v39, %v1670_v35  ;;  %v1672_v53 = vpop.f32.mrb[11].mxu0  ;;  %v1743_v54 = vpop.f32.mrb[11].mxu1  ;;  %v1748_v17 = vadd.f32 %v2507_v8, %v1741_v43  ;;  %v2168_v39 = vld [vmem:[%s4568_s1 + $0x90] sm:$0xff]  ;;  %v2177_v43 = vld [vmem:[%s4568_s1 + $0xd8] sm:$0xff] }
 0x604   :  { %v1747_v56 = vadd.f32 %v2506_v11, %v1672_v53  ;;  %v1749_v18 = vadd.f32 %v2508_v24, %v1743_v54  ;;  %v2172_v11 = vld [vmem:[%s4568_s1 + $0xb0] sm:$0xff]  ;;  %v2189_v24 = vld [vmem:[%s4568_s1 + $0x138] sm:$0xff] }
 0x605   :  { %v2509_v57 = vmul.f32 -1.442695, %v1746_v13  ;;  %v3028_v35 = vpack.c.bf16 %v2172_v11, %v2168_v39  ;;  %v2181_v13 = vld [vmem:[%s4568_s1 + $0xf8] sm:$0xff]  ;;  %v2176_v54 = vld [vmem:[%s4568_s1 + $0xd0] sm:$0xff] }
 0x606   :  { %v2510_v62 = vmul.f32 -1.442695, %v1747_v56  ;;  %v2511_v2 = vmul.f32 -1.442695, %v1749_v18  ;;  %v3030_v53 = vpack.c.bf16 %v2181_v13, %v2177_v43  ;;  %v2180_v56 = vld [vmem:[%s4568_s1 + $0xf0] sm:$0xff] }
 0x607   :  { %3132 = vpow2.f32 %v2509_v57  ;;  %v3032_v57 = vpack.c.bf16 %v2180_v56, %v2176_v54  ;;  %v2184_v8 = vld [vmem:[%s4568_s1 + $0x110] sm:$0xff] }
 0x608   :  { %3134 = vpow2.f32 %v2510_v62  ;;  %v2185_v62 = vld [vmem:[%s4568_s1 + $0x118] sm:$0xff] }
 0x609   :  { %3136 = vpow2.f32 %v2511_v2  ;;  %v3034_v18 = vpack.c.bf16 %v2189_v24, %v2185_v62  ;;  %v2188_v2 = vld [vmem:[%s4568_s1 + $0x130] sm:$0xff] }
 0x60a   :  { %3138 = vtanh.f32 %v1748_v17  ;;  %v3036_v17 = vpack.c.bf16 %v2188_v2, %v2184_v8  ;;  %v2529_v24 = vld [vmem:[%s4569_s0 + $0xf0] sm:$0xff] }
 0x611   :  { %v3133_v58 = vpop.eup %3132 }
 0x612   :  { %v3135_v22 = vpop.eup %3134  ;;  %v1753_v47 = vadd.f32 1.0, %v3133_v58  ;;  %v2193_v58 = vld [vmem:[%s4568_s1 + $0x158] sm:$0xff] }
 0x613   :  { %v1759_v6 = vadd.f32 1.0, %v3135_v22  ;;  %v3137_v28 = vpop.eup %3136  ;;  %v2197_v22 = vld [vmem:[%s4568_s1 + $0x178] sm:$0xff] }
 0x614   :  { %3140 = vrcp.f32 %v1753_v47  ;;  %v3139_v38 = vpop.eup %3138  ;;  %v1766_v45 = vadd.f32 1.0, %v3137_v28  ;;  %v3038_v47 = vpack.c.bf16 %v2197_v22, %v2193_v58  ;;  %v2517_v28 = vld [vmem:[%s4569_s0 + $0xc8] sm:$0xff] }
 0x615   :  { %3142 = vrcp.f32 %v1759_v6  ;;  %v2516_v6 = vld [vmem:[%s4569_s0 + $0xc0] sm:$0xff] }
 0x616   :  { %3144 = vrcp.f32 %v1766_v45 }
 0x61e   :  { %v3141_v34 = vpop.eup %3140 }
 0x61f   :  { %v3143_v51 = vpop.eup %3142  ;;  %v1770_v37 = vmul.f32 %v3141_v34, %v3139_v38 }
 0x620   :  { %v1769_v60 = vmul.f32 %v3143_v51, %v4114_v46  ;;  %v3145_v9 = vpop.eup %3144 }
 0x622   :  { %v4362_v48 = vadd.f32 %v1770_v37, %v1769_v60  ;;  %v2518_v60 = vld [vmem:[%s4569_s0 + $0xd0] sm:$0xff] }
 0x624   :  { %3146 = vtanh.f32 %v4362_v48 }
 0x62e   :  { %v3147_v14 = vpop.eup %3146 }
 0x62f   :  { %v1773_v30 = vmul.f32 %v3147_v14, %v3145_v9 }
 0x631   :  { %v1775_v7 = vcombine.high %v1773_v30, %v1773_v30  ;;  %v1782_v27 = vrot.slane %v1773_v30, %v3540_v50  ;;  %1974 = vmatmul.mubr.f32.vlgmr.msra.gmra.mrb[12].mxu0 %v1773_v30  ;;  %2045 = vmatmul.mubr.f32.vlgmr.msra.gmra.mrb[12].mxu1 %v1773_v30 }
 0x632   :  { %2989 = vmatpush1.bf16.msra.mxu0 %v4173_v20  ;;  %2278 = vmatprep.mubr.f32.mxu0 %v3180_v3 }
 0x633   :  { %v1789_v31 = vrot.slane %v1775_v7, %v3540_v50  ;;  %v1790_v46 = vcombine.high %v1782_v27, %v1782_v27  ;;  %v1798_v40 = vrot.slane %v1782_v27, %v3540_v50  ;;  %2512 = vst.sshfl [vmem:[%s4570_s2 + $0x5] sm:$0x1 pattern:$0x73625140] %v1782_v27  ;;  %2991 = vmatprep.subr.bf16.mxu0 %v4183_v33 }
 0x634   :  { %2349 = vmatprep.mubr.f32.mxu1 %v3180_v3 }
 0x635   :  { %v1791_v19 = vcombine.high %v1789_v31, %v1789_v31  ;;  %v1805_v23 = vrot.slane %v1789_v31, %v3540_v50  ;;  %v1812_v20 = vrot.slane %v1790_v46, %v3540_v50  ;;  %v1820_v29 = vcombine.high %v1798_v40, %v1798_v40  ;;  %2513 = vst.sshfl [vmem:[%s4570_s2 + $0xd] sm:$0x1 pattern:$0x73625140] %v1790_v46 }
 0x636   :  { %2514 = vst.sshfl [vmem:[%s4570_s2 + $0x25] sm:$0x1 pattern:$0x73625140] %v1789_v31  ;;  %2993 = vmatpush1.bf16.msra.mxu0 %v4191_v0  ;;  %v2153_v0 = vld [vmem:[%s4568_s1 + $0x18] sm:$0xff] }
 0x637   :  { %v1819_v33 = vrot.slane %v1791_v19, %v3540_v50  ;;  %v1821_v1 = vcombine.high %v1805_v23, %v1805_v23  ;;  %v1822_v3 = vcombine.high %v1812_v20, %v1812_v20  ;;  %1834 = vst [vmem:[%s4570_s2 + $0x15] sm:$0x1] %v1820_v29  ;;  %2515 = vst.sshfl [vmem:[%s4570_s2 + $0x2d] sm:$0x1 pattern:$0x73625140] %v1791_v19  ;;  %2995 = vmatprep.subr.bf16.mxu0 %v4201_v52 }
 0x638   :  { %v2157_v52 = vld [vmem:[%s4568_s1 + $0x38] sm:$0xff] }
 0x639   :  { %v1823_v21 = vcombine.high %v1819_v33, %v1819_v33  ;;  %1835 = vst [vmem:[%s4570_s2 + $0x1d] sm:$0x1] %v1822_v3  ;;  %1838 = vst [vmem:[%s4570_s2 + $0x35] sm:$0x1] %v1821_v1 }
 0x63a   :  { %2997 = vmatpush1.bf16.msra.mxu0 %v4209_v15  ;;  %v3018_v15 = vpack.c.bf16 %v2157_v52, %v2153_v0 }
 0x63b   :  { %1839 = vst [vmem:[%s4570_s2 + $0x3d] sm:$0x1] %v1823_v21  ;;  %2999 = vmatprep.subr.bf16.mxu0 %v4219_v63  ;;  %v2152_v63 = vld [vmem:[%s4568_s1 + $0x10] sm:$0xff] }
 0x63c   :  { %3019 = vmatprep.subr.bf16.mxu1 %v3018_v15 }
 0x63e   :  { %3001 = vmatpush1.bf16.msra.mxu0 %v4227_v42  ;;  %v2156_v42 = vld [vmem:[%s4568_s1 + $0x30] sm:$0xff] }
 0x63f   :  { %3003 = vmatprep.subr.bf16.mxu0 %v4237_v32  ;;  %v3020_v32 = vpack.c.bf16 %v2156_v42, %v2152_v63 }
 0x641   :  { %3021 = vmatpush1.bf16.msra.mxu1 %v3020_v32 }
 0x642   :  { %3005 = vmatpush1.bf16.msra.mxu0 %v4245_v16  ;;  %v2161_v16 = vld [vmem:[%s4568_s1 + $0x58] sm:$0xff] }
 0x643   :  { %3007 = vmatprep.subr.bf16.mxu0 %v4258_v25  ;;  %v2165_v25 = vld [vmem:[%s4568_s1 + $0x78] sm:$0xff] }
 0x646   :  { %3009 = vmatpush1.bf16.msra.mxu0 %v4269_v4  ;;  %v3022_v4 = vpack.c.bf16 %v2165_v25, %v2161_v16 }
 0x647   :  { %3011 = vmatprep.subr.bf16.mxu0 %v4283_v5  ;;  %v2160_v5 = vld [vmem:[%s4568_s1 + $0x50] sm:$0xff] }
 0x648   :  { %3023 = vmatprep.subr.bf16.mxu1 %v3022_v4 }
 0x64a   :  { %3013 = vmatpush1.bf16.msra.mxu0 %v4307_v41  ;;  %v2164_v41 = vld [vmem:[%s4568_s1 + $0x70] sm:$0xff] }
 0x64b   :  { %3015 = vmatprep.subr.bf16.mxu0 %v4322_v61  ;;  %v3024_v61 = vpack.c.bf16 %v2164_v41, %v2160_v5 }
 0x64d   :  { %3025 = vmatpush1.bf16.msra.mxu1 %v3024_v61 }
 0x64e   :  { %3017 = vmatpush1.bf16.msra.mxu0 %v4343_v55  ;;  %v3026_v55 = vpack.c.bf16 %v2173_v49, %v2169_v44  ;;  %v2527_v49 = vld [vmem:[%s4569_s0 + $0xe0] sm:$0xff] }
 0x650   :  { %3027 = vmatprep.subr.bf16.mxu1 %v3026_v55  ;;  %v2528_v55 = vld [vmem:[%s4569_s0 + $0xe8] sm:$0xff] }
 0x651   :  { %3029 = vmatpush1.bf16.msra.mxu1 %v3028_v35 }
 0x652   :  { %3031 = vmatprep.subr.bf16.mxu1 %v3030_v53 }
 0x655   :  { %3033 = vmatpush1.bf16.msra.mxu1 %v3032_v57  ;;  %v2530_v57 = vld [vmem:[%s4569_s0 + $0xf8] sm:$0xff] }
 0x656   :  { %3035 = vmatprep.subr.bf16.mxu1 %v3034_v18 }
 0x659   :  { %3037 = vmatpush1.bf16.msra.mxu1 %v3036_v17 }
 0x65a   :  { %3039 = vmatprep.subr.bf16.mxu1 %v3038_v47 }
 0x65d   :  { %3041 = vmatpush1.bf16.msra.mxu1 %v4271_v59 }
 0x65e   :  { %3043 = vmatprep.subr.bf16.mxu1 %v4295_v10 }
 0x661   :  { %3045 = vmatpush1.bf16.msra.mxu1 %v4309_v12 }
 0x662   :  { %3047 = vmatprep.subr.bf16.mxu1 %v4324_v36  ;;  %v2519_v36 = vld [vmem:[%s4569_s0 + $0xd8] sm:$0xff] }
 0x665   :  { %3049 = vmatpush1.bf16.msra.mxu1 %v4339_v26 }
 0x704   :  { %v1975_v38 = vpop.f32.mrb[12].mxu0  ;;  %v2046_v34 = vpop.f32.mrb[12].mxu1 }
 0x705   :  { %v2051_v51 = vadd.f32 %v2516_v6, %v1975_v38  ;;  %v1977_v59 = vpop.f32.mrb[13].mxu0  ;;  %v2048_v37 = vpop.f32.mrb[13].mxu1  ;;  %v2053_v14 = vadd.f32 %v2518_v60, %v2046_v34 }
 0x706   :  { %v2052_v10 = vadd.f32 %v2517_v28, %v1977_v59  ;;  %v2054_v26 = vadd.f32 %v2519_v36, %v2048_v37 }
 0x707   :  { %v2520_v45 = vmul.f32 -1.442695, %v2051_v51 }
 0x708   :  { %v2521_v12 = vmul.f32 -1.442695, %v2052_v10  ;;  %v2522_v9 = vmul.f32 -1.442695, %v2054_v26 }
 0x709   :  { %3148 = vpow2.f32 %v2520_v45 }
 0x70a   :  { %3150 = vpow2.f32 %v2521_v12 }
 0x70b   :  { %3152 = vpow2.f32 %v2522_v9 }
 0x70c   :  { %3154 = vtanh.f32 %v2053_v14 }
 0x713   :  { %v3149_v30 = vpop.eup %3148 }
 0x714   :  { %v3151_v7 = vpop.eup %3150  ;;  %v2058_v27 = vadd.f32 1.0, %v3149_v30 }
 0x715   :  { %v2064_v31 = vadd.f32 1.0, %v3151_v7  ;;  %v3153_v46 = vpop.eup %3152 }
 0x716   :  { %3156 = vrcp.f32 %v2058_v27  ;;  %v3155_v40 = vpop.eup %3154  ;;  %v2071_v29 = vadd.f32 1.0, %v3153_v46 }
 0x717   :  { %3158 = vrcp.f32 %v2064_v31 }
 0x718   :  { %3160 = vrcp.f32 %v2071_v29 }
 0x720   :  { %v3157_v19 = vpop.eup %3156 }
 0x721   :  { %v3159_v23 = vpop.eup %3158  ;;  %v2075_v20 = vmul.f32 %v3157_v19, %v3155_v40 }
 0x722   :  { %v2074_v33 = vmul.f32 %v3159_v23, %v4362_v48  ;;  %v3161_v3 = vpop.eup %3160 }
 0x724   :  { %v2076_v1 = vadd.f32 %v2075_v20, %v2074_v33 }
 0x726   :  { %3162 = vtanh.f32 %v2076_v1 }
 0x730   :  { %v3163_v21 = vpop.eup %3162 }
 0x731   :  { %v2078_v0 = vmul.f32 %v3163_v21, %v3161_v3 }
 0x733   :  { %v2080_v52 = vcombine.high %v2078_v0, %v2078_v0  ;;  %v2087_v15 = vrot.slane %v2078_v0, %v3540_v50  ;;  %2279 = vmatmul.mubr.f32.vlgmr.msra.gmra.mrb[14].mxu0 %v2078_v0  ;;  %2350 = vmatmul.mubr.f32.vlgmr.msra.gmra.mrb[14].mxu1 %v2078_v0 }
 0x735   :  { %v2094_v63 = vrot.slane %v2080_v52, %v3540_v50  ;;  %v2095_v42 = vcombine.high %v2087_v15, %v2087_v15  ;;  %v2103_v32 = vrot.slane %v2087_v15, %v3540_v50  ;;  %2523 = vst.sshfl [vmem:[%s4570_s2 + $0x6] sm:$0x1 pattern:$0x73625140] %v2087_v15 }
 0x737   :  { %v2096_v48 = vcombine.high %v2094_v63, %v2094_v63  ;;  %v2110_v16 = vrot.slane %v2094_v63, %v3540_v50  ;;  %v2117_v25 = vrot.slane %v2095_v42, %v3540_v50  ;;  %v2125_v4 = vcombine.high %v2103_v32, %v2103_v32  ;;  %2524 = vst.sshfl [vmem:[%s4570_s2 + $0xe] sm:$0x1 pattern:$0x73625140] %v2095_v42 }
 0x738   :  { %2525 = vst.sshfl [vmem:[%s4570_s2 + $0x26] sm:$0x1 pattern:$0x73625140] %v2094_v63 }
 0x739   :  { %v2124_v5 = vrot.slane %v2096_v48, %v3540_v50  ;;  %v2126_v41 = vcombine.high %v2110_v16, %v2110_v16  ;;  %v2127_v61 = vcombine.high %v2117_v25, %v2117_v25  ;;  %2139 = vst [vmem:[%s4570_s2 + $0x16] sm:$0x1] %v2125_v4  ;;  %2526 = vst.sshfl [vmem:[%s4570_s2 + $0x2e] sm:$0x1 pattern:$0x73625140] %v2096_v48 }
 0x73b   :  { %v2128_v44 = vcombine.high %v2124_v5, %v2124_v5  ;;  %2140 = vst [vmem:[%s4570_s2 + $0x1e] sm:$0x1] %v2127_v61  ;;  %2143 = vst [vmem:[%s4570_s2 + $0x36] sm:$0x1] %v2126_v41 }
 0x73d   :  { %2144 = vst [vmem:[%s4570_s2 + $0x3e] sm:$0x1] %v2128_v44 }
 0x806   :  { %v2280_v39 = vpop.f32.mrb[14].mxu0  ;;  %v2351_v11 = vpop.f32.mrb[14].mxu1 }
 0x807   :  { %v2356_v35 = vadd.f32 %v2527_v49, %v2280_v39  ;;  %v2282_v43 = vpop.f32.mrb[15].mxu0  ;;  %v2353_v13 = vpop.f32.mrb[15].mxu1  ;;  %v2358_v8 = vadd.f32 %v2529_v24, %v2351_v11 }
 0x808   :  { %v2357_v53 = vadd.f32 %v2528_v55, %v2282_v43  ;;  %v2359_v62 = vadd.f32 %v2530_v57, %v2353_v13 }
 0x809   :  { %v2531_v54 = vmul.f32 -1.442695, %v2356_v35 }
 0x80a   :  { %v2532_v56 = vmul.f32 -1.442695, %v2357_v53  ;;  %v2533_v18 = vmul.f32 -1.442695, %v2359_v62 }
 0x80b   :  { %3164 = vpow2.f32 %v2531_v54 }
 0x80c   :  { %3166 = vpow2.f32 %v2532_v56 }
 0x80d   :  { %3168 = vpow2.f32 %v2533_v18 }
 0x80e   :  { %3170 = vtanh.f32 %v2358_v8 }
 0x815   :  { %v3165_v2 = vpop.eup %3164 }
 0x816   :  { %v3167_v17 = vpop.eup %3166  ;;  %v2363_v58 = vadd.f32 1.0, %v3165_v2 }
 0x817   :  { %v2369_v22 = vadd.f32 1.0, %v3167_v17  ;;  %v3169_v47 = vpop.eup %3168 }
 0x818   :  { %3172 = vrcp.f32 %v2363_v58  ;;  %v3171_v6 = vpop.eup %3170  ;;  %v2376_v51 = vadd.f32 1.0, %v3169_v47 }
 0x819   :  { %3174 = vrcp.f32 %v2369_v22 }
 0x81a   :  { %3176 = vrcp.f32 %v2376_v51 }
 0x822   :  { %v3173_v28 = vpop.eup %3172 }
 0x823   :  { %v3175_v38 = vpop.eup %3174  ;;  %v2380_v34 = vmul.f32 %v3173_v28, %v3171_v6 }
 0x824   :  { %v2379_v59 = vmul.f32 %v3175_v38, %v2076_v1  ;;  %v3177_v10 = vpop.eup %3176 }
 0x826   :  { %v2381_v37 = vadd.f32 %v2380_v34, %v2379_v59 }
 0x828   :  { %3178 = vtanh.f32 %v2381_v37 }
 0x832   :  { %v3179_v45 = vpop.eup %3178 }
 0x833   :  { %v2383_v12 = vmul.f32 %v3179_v45, %v3177_v10 }
 0x835   :  { %v2385_v36 = vcombine.high %v2383_v12, %v2383_v12  ;;  %v2392_v26 = vrot.slane %v2383_v12, %v3540_v50 }
 0x837   :  { %v2399_v60 = vrot.slane %v2385_v36, %v3540_v50  ;;  %v2400_v9 = vcombine.high %v2392_v26, %v2392_v26  ;;  %v2408_v14 = vrot.slane %v2392_v26, %v3540_v50  ;;  %2534 = vst.sshfl [vmem:[%s4570_s2 + $0x7] sm:$0x1 pattern:$0x73625140] %v2392_v26 }
 0x839   :  { %v2401_v30 = vcombine.high %v2399_v60, %v2399_v60  ;;  %v2415_v7 = vrot.slane %v2399_v60, %v3540_v50  ;;  %v2422_v27 = vrot.slane %v2400_v9, %v3540_v50  ;;  %v2430_v31 = vcombine.high %v2408_v14, %v2408_v14  ;;  %2535 = vst.sshfl [vmem:[%s4570_s2 + $0xf] sm:$0x1 pattern:$0x73625140] %v2400_v9 }
 0x83a   :  { %2536 = vst.sshfl [vmem:[%s4570_s2 + $0x27] sm:$0x1 pattern:$0x73625140] %v2399_v60 }
 0x83b   :  { %v2429_v46 = vrot.slane %v2401_v30, %v3540_v50  ;;  %v2431_v40 = vcombine.high %v2415_v7, %v2415_v7  ;;  %v2432_v19 = vcombine.high %v2422_v27, %v2422_v27  ;;  %2444 = vst [vmem:[%s4570_s2 + $0x17] sm:$0x1] %v2430_v31  ;;  %2537 = vst.sshfl [vmem:[%s4570_s2 + $0x2f] sm:$0x1 pattern:$0x73625140] %v2401_v30 }
 0x83d   :  { %v2433_v23 = vcombine.high %v2429_v46, %v2429_v46  ;;  %2445 = vst [vmem:[%s4570_s2 + $0x1f] sm:$0x1] %v2432_v19  ;;  %2448 = vst [vmem:[%s4570_s2 + $0x37] sm:$0x1] %v2431_v40 }
 0x83f   :  { %2449 = vst [vmem:[%s4570_s2 + $0x3f] sm:$0x1] %v2433_v23 }

</bundles_post_ra>
